<compile_context>
chip_gen: v7x
topology: tpu7x:2x2x1
jax: 0.10.0
libtpu: 0.0.40
codegen_flags: <defaults>
</compile_context>

<pallas_src>
import functools

import jax
import jax.numpy as jnp
from jax.experimental import pallas as pl
from jax.experimental.pallas import tpu as pltpu

LANE = 128                 # every feature axis is zero-padded to the lane width
BN_EPS = 1e-5              # PyTorch BatchNorm1d default
W_DTYPE = jnp.bfloat16     # MXU-native weight/input dtype (f32 accumulation)


# ----------------------------------------------------------------------------
# Fused forward kernel
# ----------------------------------------------------------------------------
def _imcvae_fused_kernel(*refs, n_enc, n_dec, n_clsp, n_clsw):
    idx = 0

    def take(n):
        nonlocal idx
        out = refs[idx:idx + n]
        idx += n
        return out

    x_ref, eps_ref = take(2)

    def take_layers(n):
        flat = take(2 * n)
        return [(flat[2 * i], flat[2 * i + 1]) for i in range(n)]

    enc_layers = take_layers(n_enc)          # merged bio+batch hidden stack
    mu_w, mu_b = take(2)                     # merged mu head
    lv_w, lv_b = take(2)                     # merged logvar head
    dec_layers = take_layers(n_dec)
    clsp_layers = take_layers(n_clsp)        # bio (power) classifier
    clsw_layers = take_layers(n_clsw)        # batch (weak) classifier
    z_out, mu_out, lv_out, recon_out, biolog_out, batchlog_out = take(6)

    inv_b = 1.0 / x_ref.shape[0]

    def linear(h, w_ref, b_ref, *, bn=False, relu=False):
        # bf16 MXU inputs, f32 accumulation; BN/ReLU stay in f32 (VPU/EUP).
        y = jnp.dot(h.astype(w_ref.dtype), w_ref[...],
                    preferred_element_type=jnp.float32) + b_ref[...]
        if bn:
            # Train-mode BatchNorm1d (biased variance, gamma=1, beta=0);
            # single fused pass: sum and sum-of-squares over the batch axis.
            mean = jnp.sum(y, axis=0, keepdims=True) * inv_b
            mean_sq = jnp.sum(y * y, axis=0, keepdims=True) * inv_b
            var = jnp.maximum(mean_sq - mean * mean, 0.0)
            y = (y - mean) * jax.lax.rsqrt(var + BN_EPS)
        if relu:
            y = jnp.maximum(y, 0.0)
        return y

    # --- merged bio+batch encoders: one (block-diagonal) matmul per layer ---
    h = x_ref[...]
    for w, b in enc_layers:
        h = linear(h, w, b, bn=True, relu=True)
    mu = linear(h, mu_w, mu_b)
    logvar = linear(h, lv_w, lv_b)
    # reparameterize: z = mu + eps * exp(0.5 * logvar)   (exp lands on EUP)
    z = mu + eps_ref[...] * jnp.exp(0.5 * logvar)
    z_out[...] = z
    mu_out[...] = mu
    lv_out[...] = logvar

    # --- decoder: consumes z directly (no concat); first-layer weight only
    #     has non-zero rows on lanes [0, 2*latent) == [bio_z | batch_z] ---
    h = z
    for w, b in dec_layers[:-1]:
        h = linear(h, w, b, bn=True, relu=True)
    w, b = dec_layers[-1]
    recon_out[...] = linear(h, w, b)

    # --- bio classifier on GRL(bio_z); GRL is identity in the forward pass ---
    h = z
    for w, b in clsp_layers[:-1]:
        h = linear(h, w, b, relu=True)
    w, b = clsp_layers[-1]
    biolog_out[...] = linear(h, w, b)

    # --- batch classifier on batch_z (first-layer rows at lanes [L, 2L)) ---
    h = z
    for w, b in clsw_layers[:-1]:
        h = linear(h, w, b, relu=True)
    w, b = clsw_layers[-1]
    batchlog_out[...] = linear(h, w, b)


# ----------------------------------------------------------------------------
# Host wrapper: pad inputs to 128 lanes, run the single fused kernel, slice.
# ----------------------------------------------------------------------------
def imcvae_forward(kparams, x, eps_bio, eps_batch, *, in_sz, latent, out_sz,
                   num_batch):
    b = x.shape[0]
    p = LANE
    x_p = jnp.zeros((b, p), jnp.float32).at[:, :in_sz].set(x)
    eps_p = (jnp.zeros((b, p), jnp.float32)
             .at[:, :latent].set(eps_bio)
             .at[:, latent:2 * latent].set(eps_batch))

    flat = [x_p, eps_p]
    for w, bias in kparams["enc"]:
        flat += [w, bias]
    flat += [kparams["mu_w"], kparams["mu_b"], kparams["lv_w"], kparams["lv_b"]]
    for group in ("dec", "cls_bio", "cls_batch"):
        for w, bias in kparams[group]:
            flat += [w, bias]

    kernel = functools.partial(
        _imcvae_fused_kernel,
        n_enc=len(kparams["enc"]), n_dec=len(kparams["dec"]),
        n_clsp=len(kparams["cls_bio"]), n_clsw=len(kparams["cls_batch"]))

    vmem = pl.BlockSpec(memory_space=pltpu.MemorySpace.VMEM)
    outs = pl.pallas_call(
        kernel,
        out_shape=tuple(jax.ShapeDtypeStruct((b, p), jnp.float32)
                        for _ in range(6)),
        in_specs=[vmem] * len(flat),
        out_specs=tuple([vmem] * 6),
    )(*flat)
    z, mu, lv, recon, bio_log, batch_log = outs

    bio_z, batch_z = z[:, :latent], z[:, latent:2 * latent]
    mu1, batch_mu = mu[:, :latent], mu[:, latent:2 * latent]
    logvar1, batch_logvar = lv[:, :latent], lv[:, latent:2 * latent]
    reconstruction = recon[:, :out_sz]
    bio_batch_pred = bio_log[:, :num_batch]
    batch_batch_pred = batch_log[:, :num_batch]
    return (bio_z, mu1, logvar1, batch_z, batch_mu, batch_logvar,
            bio_batch_pred, batch_batch_pred, reconstruction)


# ----------------------------------------------------------------------------
# Deterministic parameter construction (PyTorch-like uniform init, f32)
# ----------------------------------------------------------------------------
def _init_linear(key, fan_in, fan_out):
    kw, kb = jax.random.split(key)
    bound = 1.0 / jnp.sqrt(float(fan_in))
    w = jax.random.uniform(kw, (fan_in, fan_out), jnp.float32, -bound, bound)
    b = jax.random.uniform(kb, (1, fan_out), jnp.float32, -bound, bound)
    return {"w": w, "b": b}


def _init_mlp(key, dims):
    keys = jax.random.split(key, len(dims) - 1)
    return [_init_linear(k, dims[i], dims[i + 1]) for i, k in enumerate(keys)]


def init_imcvae_params(key, *, in_sz, bio_hidden, batch_hidden, latent_sz,
                       decoder_hidden, out_sz, cls_power, cls_weak, num_batch):
    keys = jax.random.split(key, 9)
    params = {}
    params["bio_enc_hidden"] = _init_mlp(keys[0], [in_sz] + list(bio_hidden))
    params["bio_enc_mu"] = _init_linear(keys[1], bio_hidden[-1], latent_sz)
    params["bio_enc_var"] = _init_linear(keys[2], bio_hidden[-1], latent_sz)
    params["batch_enc_hidden"] = _init_mlp(keys[3], [in_sz] + list(batch_hidden))
    params["batch_enc_mu"] = _init_linear(keys[4], batch_hidden[-1], latent_sz)
    params["batch_enc_var"] = _init_linear(keys[5], batch_hidden[-1], latent_sz)
    params["decoder"] = _init_mlp(
        keys[6], [2 * latent_sz] + list(decoder_hidden) + [out_sz])
    params["bio_cls"] = _init_mlp(keys[7], [latent_sz] + list(cls_power) + [num_batch])
    params["batch_cls"] = _init_mlp(keys[8], [latent_sz] + list(cls_weak) + [num_batch])
    return params


# ----------------------------------------------------------------------------
# Build kernel-ready parameters: merged / block-diagonal, 128-lane padded, bf16
# ----------------------------------------------------------------------------
def prepare_kernel_params(params, latent_sz, w_dtype=W_DTYPE):
    p = LANE

    def place_w(blocks):
        w = jnp.zeros((p, p), jnp.float32)
        for r, c, a in blocks:
            assert r + a.shape[0] <= p and c + a.shape[1] <= p, \
                "feature dims must fit one 128-lane tile"
            # TODO(synk): dims > 128 would need multi-tile padding and a grid.
            w = w.at[r:r + a.shape[0], c:c + a.shape[1]].set(a)
        return w.astype(w_dtype)

    def place_b(blocks):
        v = jnp.zeros((1, p), jnp.float32)
        for c, a in blocks:
            v = v.at[:, c:c + a.shape[1]].set(a)
        return v

    bio_h, bat_h = params["bio_enc_hidden"], params["batch_enc_hidden"]
    assert len(bio_h) == len(bat_h), "merged encoder requires equal depth"
    # TODO(synk): unequal encoder depths would need separate encoder stacks.

    kp = {"enc": []}
    bio_off = bat_off = 0                 # layer 1: both encoders read x
    for lb, lt in zip(bio_h, bat_h):
        hb = lb["w"].shape[1]
        kp["enc"].append((
            place_w([(bio_off, 0, lb["w"]), (bat_off, hb, lt["w"])]),
            place_b([(0, lb["b"]), (hb, lt["b"])]),
        ))
        bio_off, bat_off = 0, hb          # output layout: bio [0,hb), batch [hb,..)

    kp["mu_w"] = place_w([(bio_off, 0, params["bio_enc_mu"]["w"]),
                          (bat_off, latent_sz, params["batch_enc_mu"]["w"])])
    kp["mu_b"] = place_b([(0, params["bio_enc_mu"]["b"]),
                          (latent_sz, params["batch_enc_mu"]["b"])])
    kp["lv_w"] = place_w([(bio_off, 0, params["bio_enc_var"]["w"]),
                          (bat_off, latent_sz, params["batch_enc_var"]["w"])])
    kp["lv_b"] = place_b([(0, params["bio_enc_var"]["b"]),
                          (latent_sz, params["batch_enc_var"]["b"])])

    kp["dec"] = [(place_w([(0, 0, l["w"])]), place_b([(0, l["b"])]))
                 for l in params["decoder"]]
    kp["cls_bio"] = [(place_w([(0, 0, l["w"])]), place_b([(0, l["b"])]))
                     for l in params["bio_cls"]]
    kp["cls_batch"] = [
        (place_w([(latent_sz if i == 0 else 0, 0, l["w"])]),
         place_b([(0, l["b"])]))
        for i, l in enumerate(params["batch_cls"])]
    return kp


# ----------------------------------------------------------------------------
# Pure-JAX reference mirroring the kernel math (bf16 matmuls, f32 elsewhere)
# ----------------------------------------------------------------------------
def _ref_linear(h, layer, *, bn=False, relu=False):
    y = jnp.dot(h.astype(W_DTYPE), layer["w"].astype(W_DTYPE),
                preferred_element_type=jnp.float32) + layer["b"]
    if bn:
        mean = jnp.mean(y, axis=0, keepdims=True)
        var = jnp.maximum(jnp.mean(y * y, axis=0, keepdims=True) - mean * mean, 0.0)
        y = (y - mean) * jax.lax.rsqrt(var + BN_EPS)
    if relu:
        y = jnp.maximum(y, 0.0)
    return y


def imcvae_reference(params, x, eps_bio, eps_batch):
    def encoder(hidden, mu_p, var_p, eps):
        h = x
        for lyr in hidden:
            h = _ref_linear(h, lyr, bn=True, relu=True)
        mu = _ref_linear(h, mu_p)
        lv = _ref_linear(h, var_p)
        return mu + eps * jnp.exp(0.5 * lv), mu, lv

    bio_z, mu1, lv1 = encoder(params["bio_enc_hidden"], params["bio_enc_mu"],
                              params["bio_enc_var"], eps_bio)
    bat_z, mu2, lv2 = encoder(params["batch_enc_hidden"], params["batch_enc_mu"],
                              params["batch_enc_var"], eps_batch)
    h = jnp.concatenate([bio_z, bat_z], axis=1)
    for lyr in params["decoder"][:-1]:
        h = _ref_linear(h, lyr, bn=True, relu=True)
    recon = _ref_linear(h, params["decoder"][-1])

    def classifier(z, layers):
        h = z
        for lyr in layers[:-1]:
            h = _ref_linear(h, lyr, relu=True)
        return _ref_linear(h, layers[-1])

    return (bio_z, mu1, lv1, bat_z, mu2, lv2,
            classifier(bio_z, params["bio_cls"]),
            classifier(bat_z, params["batch_cls"]), recon)


# ----------------------------------------------------------------------------
# main
# ----------------------------------------------------------------------------
if __name__ == "__main__":
    BATCH = 8
    IN_SZ = 32
    OUT_SZ = 32
    LATENT = 16
    NUM_BATCH = 4
    BIO_HIDDEN = (64, 32)
    BATCH_HIDDEN = (64, 32)
    DEC_HIDDEN = (32, 64)
    CLS_POWER = (64, 32)
    CLS_WEAK = (16,)

    key = jax.random.PRNGKey(0)
    k_param, k_x, k_e1, k_e2 = jax.random.split(key, 4)

    params = init_imcvae_params(
        k_param,
        in_sz=IN_SZ, bio_hidden=BIO_HIDDEN, batch_hidden=BATCH_HIDDEN,
        latent_sz=LATENT, decoder_hidden=DEC_HIDDEN, out_sz=OUT_SZ,
        cls_power=CLS_POWER, cls_weak=CLS_WEAK, num_batch=NUM_BATCH,
    )
    kparams = prepare_kernel_params(params, LATENT)

    x = jax.random.normal(k_x, (BATCH, IN_SZ), jnp.float32)
    eps_bio = jax.random.normal(k_e1, (BATCH, LATENT), jnp.float32)
    eps_batch = jax.random.normal(k_e2, (BATCH, LATENT), jnp.float32)

    fwd = jax.jit(functools.partial(
        imcvae_forward, in_sz=IN_SZ, latent=LATENT, out_sz=OUT_SZ,
        num_batch=NUM_BATCH))
    outputs = fwd(kparams, x, eps_bio, eps_batch)
    outputs = jax.block_until_ready(outputs)

    expected_shapes = [
        (BATCH, LATENT), (BATCH, LATENT), (BATCH, LATENT),   # bio z / mu / logvar
        (BATCH, LATENT), (BATCH, LATENT), (BATCH, LATENT),   # batch z / mu / logvar
        (BATCH, NUM_BATCH), (BATCH, NUM_BATCH),              # classifier logits
        (BATCH, OUT_SZ),                                     # reconstruction
    ]
    assert len(outputs) == 9
    refs = imcvae_reference(params, x, eps_bio, eps_batch)
    for o, s, r in zip(outputs, expected_shapes, refs):
        assert o.shape == s, (o.shape, s)
        assert bool(jnp.all(jnp.isfinite(o)))
        max_diff = float(jnp.max(jnp.abs(o - r)))
        assert max_diff < 5e-2, ("kernel/reference mismatch", max_diff)

    print("KERNEL_OK")
</pallas_src>

<mosaic_0001>
module attributes {stable_mosaic.version = 11 : i64} {
  func.func @_imcvae_fused_kernel(%arg0: memref<8x128xf32, #tpu.memory_space<vmem>>, %arg1: memref<8x128xf32, #tpu.memory_space<vmem>>, %arg2: memref<128x128xbf16, #tpu.memory_space<vmem>>, %arg3: memref<1x128xf32, #tpu.memory_space<vmem>>, %arg4: memref<128x128xbf16, #tpu.memory_space<vmem>>, %arg5: memref<1x128xf32, #tpu.memory_space<vmem>>, %arg6: memref<128x128xbf16, #tpu.memory_space<vmem>>, %arg7: memref<1x128xf32, #tpu.memory_space<vmem>>, %arg8: memref<128x128xbf16, #tpu.memory_space<vmem>>, %arg9: memref<1x128xf32, #tpu.memory_space<vmem>>, %arg10: memref<128x128xbf16, #tpu.memory_space<vmem>>, %arg11: memref<1x128xf32, #tpu.memory_space<vmem>>, %arg12: memref<128x128xbf16, #tpu.memory_space<vmem>>, %arg13: memref<1x128xf32, #tpu.memory_space<vmem>>, %arg14: memref<128x128xbf16, #tpu.memory_space<vmem>>, %arg15: memref<1x128xf32, #tpu.memory_space<vmem>>, %arg16: memref<128x128xbf16, #tpu.memory_space<vmem>>, %arg17: memref<1x128xf32, #tpu.memory_space<vmem>>, %arg18: memref<128x128xbf16, #tpu.memory_space<vmem>>, %arg19: memref<1x128xf32, #tpu.memory_space<vmem>>, %arg20: memref<128x128xbf16, #tpu.memory_space<vmem>>, %arg21: memref<1x128xf32, #tpu.memory_space<vmem>>, %arg22: memref<128x128xbf16, #tpu.memory_space<vmem>>, %arg23: memref<1x128xf32, #tpu.memory_space<vmem>>, %arg24: memref<128x128xbf16, #tpu.memory_space<vmem>>, %arg25: memref<1x128xf32, #tpu.memory_space<vmem>>, %arg26: memref<8x128xf32, #tpu.memory_space<vmem>>, %arg27: memref<8x128xf32, #tpu.memory_space<vmem>>, %arg28: memref<8x128xf32, #tpu.memory_space<vmem>>, %arg29: memref<8x128xf32, #tpu.memory_space<vmem>>, %arg30: memref<8x128xf32, #tpu.memory_space<vmem>>, %arg31: memref<8x128xf32, #tpu.memory_space<vmem>>) attributes {dimension_semantics = [], scalar_prefetch = 0 : i64, scratch_operands = 0 : i64, tpu.core_type = #tpu.core_type<tc>} {
    %c0 = arith.constant 0 : index
    %c0_0 = arith.constant 0 : index
    %0 = vector.load %arg0[%c0, %c0_0] : memref<8x128xf32, #tpu.memory_space<vmem>>, vector<8x128xf32>
    %1 = arith.truncf %0 : vector<8x128xf32> to vector<8x128xbf16>
    %c0_1 = arith.constant 0 : index
    %c0_2 = arith.constant 0 : index
    %2 = vector.load %arg2[%c0_1, %c0_2] : memref<128x128xbf16, #tpu.memory_space<vmem>>, vector<128x128xbf16>
    %cst = arith.constant dense<0.000000e+00> : vector<8x128xf32>
    %3 = tpu.matmul %1, %2, %cst {dimension_numbers = #tpu.dot_dimension_numbers<[1], [0], [0], [1], [0, 0, 1, 1], [], []>} : vector<8x128xbf16>, vector<128x128xbf16>, vector<8x128xf32> -> vector<8x128xf32>
    %c0_3 = arith.constant 0 : index
    %c0_4 = arith.constant 0 : index
    %4 = vector.load %arg3[%c0_3, %c0_4] : memref<1x128xf32, #tpu.memory_space<vmem>>, vector<1x128xf32>
    %5 = vector.broadcast %4 : vector<1x128xf32> to vector<8x128xf32>
    %6 = arith.addf %3, %5 : vector<8x128xf32>
    %cst_5 = arith.constant dense<0.000000e+00> : vector<128xf32>
    %7 = vector.multi_reduction <add>, %6, %cst_5 [0] : vector<8x128xf32> to vector<128xf32>
    %8 = vector.shape_cast %7 : vector<128xf32> to vector<1x128xf32>
    %cst_6 = arith.constant 1.250000e-01 : f32
    %9 = vector.broadcast %cst_6 : f32 to vector<1x128xf32>
    %10 = arith.mulf %8, %9 : vector<1x128xf32>
    %11 = arith.mulf %6, %6 : vector<8x128xf32>
    %cst_7 = arith.constant dense<0.000000e+00> : vector<128xf32>
    %12 = vector.multi_reduction <add>, %11, %cst_7 [0] : vector<8x128xf32> to vector<128xf32>
    %13 = vector.shape_cast %12 : vector<128xf32> to vector<1x128xf32>
    %cst_8 = arith.constant 1.250000e-01 : f32
    %14 = vector.broadcast %cst_8 : f32 to vector<1x128xf32>
    %15 = arith.mulf %13, %14 : vector<1x128xf32>
    %16 = arith.mulf %10, %10 : vector<1x128xf32>
    %17 = arith.subf %15, %16 : vector<1x128xf32>
    %cst_9 = arith.constant 0.000000e+00 : f32
    %18 = vector.broadcast %cst_9 : f32 to vector<1x128xf32>
    %19 = arith.maximumf %17, %18 : vector<1x128xf32>
    %20 = vector.broadcast %10 : vector<1x128xf32> to vector<8x128xf32>
    %21 = arith.subf %6, %20 : vector<8x128xf32>
    %cst_10 = arith.constant 9.99999974E-6 : f32
    %22 = vector.broadcast %cst_10 : f32 to vector<1x128xf32>
    %23 = arith.addf %19, %22 : vector<1x128xf32>
    %24 = math.rsqrt %23 : vector<1x128xf32>
    %25 = vector.broadcast %24 : vector<1x128xf32> to vector<8x128xf32>
    %26 = arith.mulf %21, %25 : vector<8x128xf32>
    %cst_11 = arith.constant 0.000000e+00 : f32
    %27 = vector.broadcast %cst_11 : f32 to vector<8x128xf32>
    %28 = arith.maximumf %26, %27 : vector<8x128xf32>
    %29 = arith.truncf %28 : vector<8x128xf32> to vector<8x128xbf16>
    %c0_12 = arith.constant 0 : index
    %c0_13 = arith.constant 0 : index
    %30 = vector.load %arg4[%c0_12, %c0_13] : memref<128x128xbf16, #tpu.memory_space<vmem>>, vector<128x128xbf16>
    %cst_14 = arith.constant dense<0.000000e+00> : vector<8x128xf32>
    %31 = tpu.matmul %29, %30, %cst_14 {dimension_numbers = #tpu.dot_dimension_numbers<[1], [0], [0], [1], [0, 0, 1, 1], [], []>} : vector<8x128xbf16>, vector<128x128xbf16>, vector<8x128xf32> -> vector<8x128xf32>
    %c0_15 = arith.constant 0 : index
    %c0_16 = arith.constant 0 : index
    %32 = vector.load %arg5[%c0_15, %c0_16] : memref<1x128xf32, #tpu.memory_space<vmem>>, vector<1x128xf32>
    %33 = vector.broadcast %32 : vector<1x128xf32> to vector<8x128xf32>
    %34 = arith.addf %31, %33 : vector<8x128xf32>
    %cst_17 = arith.constant dense<0.000000e+00> : vector<128xf32>
    %35 = vector.multi_reduction <add>, %34, %cst_17 [0] : vector<8x128xf32> to vector<128xf32>
    %36 = vector.shape_cast %35 : vector<128xf32> to vector<1x128xf32>
    %cst_18 = arith.constant 1.250000e-01 : f32
    %37 = vector.broadcast %cst_18 : f32 to vector<1x128xf32>
    %38 = arith.mulf %36, %37 : vector<1x128xf32>
    %39 = arith.mulf %34, %34 : vector<8x128xf32>
    %cst_19 = arith.constant dense<0.000000e+00> : vector<128xf32>
    %40 = vector.multi_reduction <add>, %39, %cst_19 [0] : vector<8x128xf32> to vector<128xf32>
    %41 = vector.shape_cast %40 : vector<128xf32> to vector<1x128xf32>
    %cst_20 = arith.constant 1.250000e-01 : f32
    %42 = vector.broadcast %cst_20 : f32 to vector<1x128xf32>
    %43 = arith.mulf %41, %42 : vector<1x128xf32>
    %44 = arith.mulf %38, %38 : vector<1x128xf32>
    %45 = arith.subf %43, %44 : vector<1x128xf32>
    %cst_21 = arith.constant 0.000000e+00 : f32
    %46 = vector.broadcast %cst_21 : f32 to vector<1x128xf32>
    %47 = arith.maximumf %45, %46 : vector<1x128xf32>
    %48 = vector.broadcast %38 : vector<1x128xf32> to vector<8x128xf32>
    %49 = arith.subf %34, %48 : vector<8x128xf32>
    %cst_22 = arith.constant 9.99999974E-6 : f32
    %50 = vector.broadcast %cst_22 : f32 to vector<1x128xf32>
    %51 = arith.addf %47, %50 : vector<1x128xf32>
    %52 = math.rsqrt %51 : vector<1x128xf32>
    %53 = vector.broadcast %52 : vector<1x128xf32> to vector<8x128xf32>
    %54 = arith.mulf %49, %53 : vector<8x128xf32>
    %cst_23 = arith.constant 0.000000e+00 : f32
    %55 = vector.broadcast %cst_23 : f32 to vector<8x128xf32>
    %56 = arith.maximumf %54, %55 : vector<8x128xf32>
    %57 = arith.truncf %56 : vector<8x128xf32> to vector<8x128xbf16>
    %c0_24 = arith.constant 0 : index
    %c0_25 = arith.constant 0 : index
    %58 = vector.load %arg6[%c0_24, %c0_25] : memref<128x128xbf16, #tpu.memory_space<vmem>>, vector<128x128xbf16>
    %cst_26 = arith.constant dense<0.000000e+00> : vector<8x128xf32>
    %59 = tpu.matmul %57, %58, %cst_26 {dimension_numbers = #tpu.dot_dimension_numbers<[1], [0], [0], [1], [0, 0, 1, 1], [], []>} : vector<8x128xbf16>, vector<128x128xbf16>, vector<8x128xf32> -> vector<8x128xf32>
    %c0_27 = arith.constant 0 : index
    %c0_28 = arith.constant 0 : index
    %60 = vector.load %arg7[%c0_27, %c0_28] : memref<1x128xf32, #tpu.memory_space<vmem>>, vector<1x128xf32>
    %61 = vector.broadcast %60 : vector<1x128xf32> to vector<8x128xf32>
    %62 = arith.addf %59, %61 : vector<8x128xf32>
    %63 = arith.truncf %56 : vector<8x128xf32> to vector<8x128xbf16>
    %c0_29 = arith.constant 0 : index
    %c0_30 = arith.constant 0 : index
    %64 = vector.load %arg8[%c0_29, %c0_30] : memref<128x128xbf16, #tpu.memory_space<vmem>>, vector<128x128xbf16>
    %cst_31 = arith.constant dense<0.000000e+00> : vector<8x128xf32>
    %65 = tpu.matmul %63, %64, %cst_31 {dimension_numbers = #tpu.dot_dimension_numbers<[1], [0], [0], [1], [0, 0, 1, 1], [], []>} : vector<8x128xbf16>, vector<128x128xbf16>, vector<8x128xf32> -> vector<8x128xf32>
    %c0_32 = arith.constant 0 : index
    %c0_33 = arith.constant 0 : index
    %66 = vector.load %arg9[%c0_32, %c0_33] : memref<1x128xf32, #tpu.memory_space<vmem>>, vector<1x128xf32>
    %67 = vector.broadcast %66 : vector<1x128xf32> to vector<8x128xf32>
    %68 = arith.addf %65, %67 : vector<8x128xf32>
    %c0_34 = arith.constant 0 : index
    %c0_35 = arith.constant 0 : index
    %69 = vector.load %arg1[%c0_34, %c0_35] : memref<8x128xf32, #tpu.memory_space<vmem>>, vector<8x128xf32>
    %cst_36 = arith.constant 5.000000e-01 : f32
    %70 = vector.broadcast %cst_36 : f32 to vector<8x128xf32>
    %71 = arith.mulf %70, %68 : vector<8x128xf32>
    %72 = math.exp %71 : vector<8x128xf32>
    %73 = arith.mulf %69, %72 : vector<8x128xf32>
    %74 = arith.addf %62, %73 : vector<8x128xf32>
    %c0_37 = arith.constant 0 : index
    %c0_38 = arith.constant 0 : index
    %75 = vector.load %arg26[%c0_37, %c0_38] : memref<8x128xf32, #tpu.memory_space<vmem>>, vector<8x128xf32>
    tpu.vector_store %arg26[%c0_37, %c0_38], %74 {strides = array<i32>} : memref<8x128xf32, #tpu.memory_space<vmem>>, vector<8x128xf32>,
    %c0_39 = arith.constant 0 : index
    %c0_40 = arith.constant 0 : index
    %76 = vector.load %arg27[%c0_39, %c0_40] : memref<8x128xf32, #tpu.memory_space<vmem>>, vector<8x128xf32>
    tpu.vector_store %arg27[%c0_39, %c0_40], %62 {strides = array<i32>} : memref<8x128xf32, #tpu.memory_space<vmem>>, vector<8x128xf32>,
    %c0_41 = arith.constant 0 : index
    %c0_42 = arith.constant 0 : index
    %77 = vector.load %arg28[%c0_41, %c0_42] : memref<8x128xf32, #tpu.memory_space<vmem>>, vector<8x128xf32>
    tpu.vector_store %arg28[%c0_41, %c0_42], %68 {strides = array<i32>} : memref<8x128xf32, #tpu.memory_space<vmem>>, vector<8x128xf32>,
    %78 = arith.truncf %74 : vector<8x128xf32> to vector<8x128xbf16>
    %c0_43 = arith.constant 0 : index
    %c0_44 = arith.constant 0 : index
    %79 = vector.load %arg10[%c0_43, %c0_44] : memref<128x128xbf16, #tpu.memory_space<vmem>>, vector<128x128xbf16>
    %cst_45 = arith.constant dense<0.000000e+00> : vector<8x128xf32>
    %80 = tpu.matmul %78, %79, %cst_45 {dimension_numbers = #tpu.dot_dimension_numbers<[1], [0], [0], [1], [0, 0, 1, 1], [], []>} : vector<8x128xbf16>, vector<128x128xbf16>, vector<8x128xf32> -> vector<8x128xf32>
    %c0_46 = arith.constant 0 : index
    %c0_47 = arith.constant 0 : index
    %81 = vector.load %arg11[%c0_46, %c0_47] : memref<1x128xf32, #tpu.memory_space<vmem>>, vector<1x128xf32>
    %82 = vector.broadcast %81 : vector<1x128xf32> to vector<8x128xf32>
    %83 = arith.addf %80, %82 : vector<8x128xf32>
    %cst_48 = arith.constant dense<0.000000e+00> : vector<128xf32>
    %84 = vector.multi_reduction <add>, %83, %cst_48 [0] : vector<8x128xf32> to vector<128xf32>
    %85 = vector.shape_cast %84 : vector<128xf32> to vector<1x128xf32>
    %cst_49 = arith.constant 1.250000e-01 : f32
    %86 = vector.broadcast %cst_49 : f32 to vector<1x128xf32>
    %87 = arith.mulf %85, %86 : vector<1x128xf32>
    %88 = arith.mulf %83, %83 : vector<8x128xf32>
    %cst_50 = arith.constant dense<0.000000e+00> : vector<128xf32>
    %89 = vector.multi_reduction <add>, %88, %cst_50 [0] : vector<8x128xf32> to vector<128xf32>
    %90 = vector.shape_cast %89 : vector<128xf32> to vector<1x128xf32>
    %cst_51 = arith.constant 1.250000e-01 : f32
    %91 = vector.broadcast %cst_51 : f32 to vector<1x128xf32>
    %92 = arith.mulf %90, %91 : vector<1x128xf32>
    %93 = arith.mulf %87, %87 : vector<1x128xf32>
    %94 = arith.subf %92, %93 : vector<1x128xf32>
    %cst_52 = arith.constant 0.000000e+00 : f32
    %95 = vector.broadcast %cst_52 : f32 to vector<1x128xf32>
    %96 = arith.maximumf %94, %95 : vector<1x128xf32>
    %97 = vector.broadcast %87 : vector<1x128xf32> to vector<8x128xf32>
    %98 = arith.subf %83, %97 : vector<8x128xf32>
    %cst_53 = arith.constant 9.99999974E-6 : f32
    %99 = vector.broadcast %cst_53 : f32 to vector<1x128xf32>
    %100 = arith.addf %96, %99 : vector<1x128xf32>
    %101 = math.rsqrt %100 : vector<1x128xf32>
    %102 = vector.broadcast %101 : vector<1x128xf32> to vector<8x128xf32>
    %103 = arith.mulf %98, %102 : vector<8x128xf32>
    %cst_54 = arith.constant 0.000000e+00 : f32
    %104 = vector.broadcast %cst_54 : f32 to vector<8x128xf32>
    %105 = arith.maximumf %103, %104 : vector<8x128xf32>
    %106 = arith.truncf %105 : vector<8x128xf32> to vector<8x128xbf16>
    %c0_55 = arith.constant 0 : index
    %c0_56 = arith.constant 0 : index
    %107 = vector.load %arg12[%c0_55, %c0_56] : memref<128x128xbf16, #tpu.memory_space<vmem>>, vector<128x128xbf16>
    %cst_57 = arith.constant dense<0.000000e+00> : vector<8x128xf32>
    %108 = tpu.matmul %106, %107, %cst_57 {dimension_numbers = #tpu.dot_dimension_numbers<[1], [0], [0], [1], [0, 0, 1, 1], [], []>} : vector<8x128xbf16>, vector<128x128xbf16>, vector<8x128xf32> -> vector<8x128xf32>
    %c0_58 = arith.constant 0 : index
    %c0_59 = arith.constant 0 : index
    %109 = vector.load %arg13[%c0_58, %c0_59] : memref<1x128xf32, #tpu.memory_space<vmem>>, vector<1x128xf32>
    %110 = vector.broadcast %109 : vector<1x128xf32> to vector<8x128xf32>
    %111 = arith.addf %108, %110 : vector<8x128xf32>
    %cst_60 = arith.constant dense<0.000000e+00> : vector<128xf32>
    %112 = vector.multi_reduction <add>, %111, %cst_60 [0] : vector<8x128xf32> to vector<128xf32>
    %113 = vector.shape_cast %112 : vector<128xf32> to vector<1x128xf32>
    %cst_61 = arith.constant 1.250000e-01 : f32
    %114 = vector.broadcast %cst_61 : f32 to vector<1x128xf32>
    %115 = arith.mulf %113, %114 : vector<1x128xf32>
    %116 = arith.mulf %111, %111 : vector<8x128xf32>
    %cst_62 = arith.constant dense<0.000000e+00> : vector<128xf32>
    %117 = vector.multi_reduction <add>, %116, %cst_62 [0] : vector<8x128xf32> to vector<128xf32>
    %118 = vector.shape_cast %117 : vector<128xf32> to vector<1x128xf32>
    %cst_63 = arith.constant 1.250000e-01 : f32
    %119 = vector.broadcast %cst_63 : f32 to vector<1x128xf32>
    %120 = arith.mulf %118, %119 : vector<1x128xf32>
    %121 = arith.mulf %115, %115 : vector<1x128xf32>
    %122 = arith.subf %120, %121 : vector<1x128xf32>
    %cst_64 = arith.constant 0.000000e+00 : f32
    %123 = vector.broadcast %cst_64 : f32 to vector<1x128xf32>
    %124 = arith.maximumf %122, %123 : vector<1x128xf32>
    %125 = vector.broadcast %115 : vector<1x128xf32> to vector<8x128xf32>
    %126 = arith.subf %111, %125 : vector<8x128xf32>
    %cst_65 = arith.constant 9.99999974E-6 : f32
    %127 = vector.broadcast %cst_65 : f32 to vector<1x128xf32>
    %128 = arith.addf %124, %127 : vector<1x128xf32>
    %129 = math.rsqrt %128 : vector<1x128xf32>
    %130 = vector.broadcast %129 : vector<1x128xf32> to vector<8x128xf32>
    %131 = arith.mulf %126, %130 : vector<8x128xf32>
    %cst_66 = arith.constant 0.000000e+00 : f32
    %132 = vector.broadcast %cst_66 : f32 to vector<8x128xf32>
    %133 = arith.maximumf %131, %132 : vector<8x128xf32>
    %134 = arith.truncf %133 : vector<8x128xf32> to vector<8x128xbf16>
    %c0_67 = arith.constant 0 : index
    %c0_68 = arith.constant 0 : index
    %135 = vector.load %arg14[%c0_67, %c0_68] : memref<128x128xbf16, #tpu.memory_space<vmem>>, vector<128x128xbf16>
    %cst_69 = arith.constant dense<0.000000e+00> : vector<8x128xf32>
    %136 = tpu.matmul %134, %135, %cst_69 {dimension_numbers = #tpu.dot_dimension_numbers<[1], [0], [0], [1], [0, 0, 1, 1], [], []>} : vector<8x128xbf16>, vector<128x128xbf16>, vector<8x128xf32> -> vector<8x128xf32>
    %c0_70 = arith.constant 0 : index
    %c0_71 = arith.constant 0 : index
    %137 = vector.load %arg15[%c0_70, %c0_71] : memref<1x128xf32, #tpu.memory_space<vmem>>, vector<1x128xf32>
    %138 = vector.broadcast %137 : vector<1x128xf32> to vector<8x128xf32>
    %139 = arith.addf %136, %138 : vector<8x128xf32>
    %c0_72 = arith.constant 0 : index
    %c0_73 = arith.constant 0 : index
    %140 = vector.load %arg29[%c0_72, %c0_73] : memref<8x128xf32, #tpu.memory_space<vmem>>, vector<8x128xf32>
    tpu.vector_store %arg29[%c0_72, %c0_73], %139 {strides = array<i32>} : memref<8x128xf32, #tpu.memory_space<vmem>>, vector<8x128xf32>,
    %141 = arith.truncf %74 : vector<8x128xf32> to vector<8x128xbf16>
    %c0_74 = arith.constant 0 : index
    %c0_75 = arith.constant 0 : index
    %142 = vector.load %arg16[%c0_74, %c0_75] : memref<128x128xbf16, #tpu.memory_space<vmem>>, vector<128x128xbf16>
    %cst_76 = arith.constant dense<0.000000e+00> : vector<8x128xf32>
    %143 = tpu.matmul %141, %142, %cst_76 {dimension_numbers = #tpu.dot_dimension_numbers<[1], [0], [0], [1], [0, 0, 1, 1], [], []>} : vector<8x128xbf16>, vector<128x128xbf16>, vector<8x128xf32> -> vector<8x128xf32>
    %c0_77 = arith.constant 0 : index
    %c0_78 = arith.constant 0 : index
    %144 = vector.load %arg17[%c0_77, %c0_78] : memref<1x128xf32, #tpu.memory_space<vmem>>, vector<1x128xf32>
    %145 = vector.broadcast %144 : vector<1x128xf32> to vector<8x128xf32>
    %146 = arith.addf %143, %145 : vector<8x128xf32>
    %cst_79 = arith.constant 0.000000e+00 : f32
    %147 = vector.broadcast %cst_79 : f32 to vector<8x128xf32>
    %148 = arith.maximumf %146, %147 : vector<8x128xf32>
    %149 = arith.truncf %148 : vector<8x128xf32> to vector<8x128xbf16>
    %c0_80 = arith.constant 0 : index
    %c0_81 = arith.constant 0 : index
    %150 = vector.load %arg18[%c0_80, %c0_81] : memref<128x128xbf16, #tpu.memory_space<vmem>>, vector<128x128xbf16>
    %cst_82 = arith.constant dense<0.000000e+00> : vector<8x128xf32>
    %151 = tpu.matmul %149, %150, %cst_82 {dimension_numbers = #tpu.dot_dimension_numbers<[1], [0], [0], [1], [0, 0, 1, 1], [], []>} : vector<8x128xbf16>, vector<128x128xbf16>, vector<8x128xf32> -> vector<8x128xf32>
    %c0_83 = arith.constant 0 : index
    %c0_84 = arith.constant 0 : index
    %152 = vector.load %arg19[%c0_83, %c0_84] : memref<1x128xf32, #tpu.memory_space<vmem>>, vector<1x128xf32>
    %153 = vector.broadcast %152 : vector<1x128xf32> to vector<8x128xf32>
    %154 = arith.addf %151, %153 : vector<8x128xf32>
    %cst_85 = arith.constant 0.000000e+00 : f32
    %155 = vector.broadcast %cst_85 : f32 to vector<8x128xf32>
    %156 = arith.maximumf %154, %155 : vector<8x128xf32>
    %157 = arith.truncf %156 : vector<8x128xf32> to vector<8x128xbf16>
    %c0_86 = arith.constant 0 : index
    %c0_87 = arith.constant 0 : index
    %158 = vector.load %arg20[%c0_86, %c0_87] : memref<128x128xbf16, #tpu.memory_space<vmem>>, vector<128x128xbf16>
    %cst_88 = arith.constant dense<0.000000e+00> : vector<8x128xf32>
    %159 = tpu.matmul %157, %158, %cst_88 {dimension_numbers = #tpu.dot_dimension_numbers<[1], [0], [0], [1], [0, 0, 1, 1], [], []>} : vector<8x128xbf16>, vector<128x128xbf16>, vector<8x128xf32> -> vector<8x128xf32>
    %c0_89 = arith.constant 0 : index
    %c0_90 = arith.constant 0 : index
    %160 = vector.load %arg21[%c0_89, %c0_90] : memref<1x128xf32, #tpu.memory_space<vmem>>, vector<1x128xf32>
    %161 = vector.broadcast %160 : vector<1x128xf32> to vector<8x128xf32>
    %162 = arith.addf %159, %161 : vector<8x128xf32>
    %c0_91 = arith.constant 0 : index
    %c0_92 = arith.constant 0 : index
    %163 = vector.load %arg30[%c0_91, %c0_92] : memref<8x128xf32, #tpu.memory_space<vmem>>, vector<8x128xf32>
    tpu.vector_store %arg30[%c0_91, %c0_92], %162 {strides = array<i32>} : memref<8x128xf32, #tpu.memory_space<vmem>>, vector<8x128xf32>,
    %164 = arith.truncf %74 : vector<8x128xf32> to vector<8x128xbf16>
    %c0_93 = arith.constant 0 : index
    %c0_94 = arith.constant 0 : index
    %165 = vector.load %arg22[%c0_93, %c0_94] : memref<128x128xbf16, #tpu.memory_space<vmem>>, vector<128x128xbf16>
    %cst_95 = arith.constant dense<0.000000e+00> : vector<8x128xf32>
    %166 = tpu.matmul %164, %165, %cst_95 {dimension_numbers = #tpu.dot_dimension_numbers<[1], [0], [0], [1], [0, 0, 1, 1], [], []>} : vector<8x128xbf16>, vector<128x128xbf16>, vector<8x128xf32> -> vector<8x128xf32>
    %c0_96 = arith.constant 0 : index
    %c0_97 = arith.constant 0 : index
    %167 = vector.load %arg23[%c0_96, %c0_97] : memref<1x128xf32, #tpu.memory_space<vmem>>, vector<1x128xf32>
    %168 = vector.broadcast %167 : vector<1x128xf32> to vector<8x128xf32>
    %169 = arith.addf %166, %168 : vector<8x128xf32>
    %cst_98 = arith.constant 0.000000e+00 : f32
    %170 = vector.broadcast %cst_98 : f32 to vector<8x128xf32>
    %171 = arith.maximumf %169, %170 : vector<8x128xf32>
    %172 = arith.truncf %171 : vector<8x128xf32> to vector<8x128xbf16>
    %c0_99 = arith.constant 0 : index
    %c0_100 = arith.constant 0 : index
    %173 = vector.load %arg24[%c0_99, %c0_100] : memref<128x128xbf16, #tpu.memory_space<vmem>>, vector<128x128xbf16>
    %cst_101 = arith.constant dense<0.000000e+00> : vector<8x128xf32>
    %174 = tpu.matmul %172, %173, %cst_101 {dimension_numbers = #tpu.dot_dimension_numbers<[1], [0], [0], [1], [0, 0, 1, 1], [], []>} : vector<8x128xbf16>, vector<128x128xbf16>, vector<8x128xf32> -> vector<8x128xf32>
    %c0_102 = arith.constant 0 : index
    %c0_103 = arith.constant 0 : index
    %175 = vector.load %arg25[%c0_102, %c0_103] : memref<1x128xf32, #tpu.memory_space<vmem>>, vector<1x128xf32>
    %176 = vector.broadcast %175 : vector<1x128xf32> to vector<8x128xf32>
    %177 = arith.addf %174, %176 : vector<8x128xf32>
    %c0_104 = arith.constant 0 : index
    %c0_105 = arith.constant 0 : index
    %178 = vector.load %arg31[%c0_104, %c0_105] : memref<8x128xf32, #tpu.memory_space<vmem>>, vector<8x128xf32>
    tpu.vector_store %arg31[%c0_104, %c0_105], %177 {strides = array<i32>} : memref<8x128xf32, #tpu.memory_space<vmem>>, vector<8x128xf32>,
    return
  }
}

</mosaic_0001>

<bundles_post_ra>
// kernel: imcvae_forward.1
= control target key start
LH: loop header
LB: loop body
LE: loop exit
PB: predicated region body
PF: predicated region fallthrough
CT: control target
= control target key end

     0   :  { %s3035_s6 = smov 1   ;;  %s3036_s10 = smov 2   ;;  %s3563_s0 = inlined_call_operand.smem [shape: u32[32], index: -1, kind: input, shape index: {}] }
   0x1   :  { %s3100_s5 = sld [smem:[%s3563_s0]]   ;;  %s3037_s14 = smov 3  }
   0x2   :  { %s3105_s9 = sld [smem:[%s3563_s0 + %s3035_s6]]   ;;  %s3038_s18 = smov 4  }
   0x3   :  { %s3110_s13 = sld [smem:[%s3563_s0 + %s3036_s10]]   ;;  %s3039_s22 = smov 5  }
   0x4   :  { %s3115_s17 = sld [smem:[%s3563_s0 + %s3037_s14]]   ;;  %s3040_s26 = smov 6  }
   0x5   :  { %s3120_s21 = sld [smem:[%s3563_s0 + %s3038_s18]]   ;;  %s3041_s30 = smov 7  }
   0x6   :  { %s3125_s25 = sld [smem:[%s3563_s0 + %s3039_s22]]   ;;  %s3042_s4 = smov 8  }
   0x7   :  { %3574 = sst [smem:[#allocation48_spill]] %s3100_s5  ;;  %s3043_s10 = smov 9  }
   0x8   :  { %3575 = sst [smem:[#allocation49_spill]] %s3105_s9  ;;  %s3044_s15 = smov 10  }
   0x9   :  { %3576 = sst [smem:[#allocation50_spill]] %s3110_s13  ;;  %s3045_s20 = smov 11  }
   0xa   :  { %s3130_s29 = sld [smem:[%s3563_s0 + %s3040_s26]]   ;;  %s3046_s26 = smov 12  }
   0xb   :  { %3577 = sst [smem:[#allocation51_spill]] %s3120_s21  ;;  %s3047_s1 = smov 13  }
   0xc   :  { %s3135_s3 = sld [smem:[%s3563_s0 + %s3041_s30]]   ;;  %s3048_s7 = smov 14  }
   0xd   :  { %s3140_s8 = sld [smem:[%s3563_s0 + %s3042_s4]]   ;;  %s3050_s22 = smov 16  }
   0xe   :  { %s3145_s14 = sld [smem:[%s3563_s0 + %s3043_s10]]   ;;  %s3051_s28 = smov 17  }
   0xf   :  { %s3150_s19 = sld [smem:[%s3563_s0 + %s3044_s15]]   ;;  %s3049_s15 = smov 15  }
  0x10   :  { %3578 = sst [smem:[#allocation52_spill]] %s3130_s29 }
  0x11   :  { %s3155_s24 = sld [smem:[%s3563_s0 + %s3045_s20]]  }
  0x12   :  { %s3160_s30 = sld [smem:[%s3563_s0 + %s3046_s26]]  }
  0x13   :  { %s3165_s6 = sld [smem:[%s3563_s0 + %s3047_s1]]  }
  0x14   :  { %s3170_s12 = sld [smem:[%s3563_s0 + %s3048_s7]]   ;;  %s3052_s7 = smov 18  }
  0x15   :  { %s3175_s20 = sld [smem:[%s3563_s0 + %s3049_s15]]   ;;  %s3053_s15 = smov 19  }
  0x16   :  { %s3180_s27 = sld [smem:[%s3563_s0 + %s3050_s22]]   ;;  %s3054_s22 = smov 20  }
  0x17   :  { %s3185_s4 = sld [smem:[%s3563_s0 + %s3051_s28]]   ;;  %s3055_s28 = smov 21  }
  0x18   :  { %s3190_s9 = sld [smem:[%s3563_s0 + %s3052_s7]]   ;;  %s3056_s7 = smov 22  }
  0x19   :  { %3579 = sst [smem:[#allocation53_spill]] %s3165_s6 }
  0x1a   :  { %s3195_s29 = sld [smem:[%s3563_s0 + %s3053_s15]]   ;;  %s3057_s15 = smov 23  }
  0x1b   :  { %3580 = sst [smem:[#allocation54_spill]] %s3175_s20 }
  0x1c   :  { %s3200_s21 = sld [smem:[%s3563_s0 + %s3054_s22]]   ;;  %s3058_s22 = smov 24  }
  0x1d   :  { %3581 = sst [smem:[#allocation55_spill]] %s3185_s4 }
  0x1e   :  { %s3205_s5 = sld [smem:[%s3563_s0 + %s3055_s28]]   ;;  %s3059_s28 = smov 25  }
  0x1f   :  { %s3210_s13 = sld [smem:[%s3563_s0 + %s3056_s7]]   ;;  %s3060_s7 = smov 26  }
  0x20   :  { %3582 = sst [smem:[#allocation56_spill]] %s3195_s29 }
  0x21   :  { %s3215_s29 = sld [smem:[%s3563_s0 + %s3057_s15]]   ;;  %s3061_s15 = smov 27  }
  0x22   :  { %s3220_s4 = sld [smem:[%s3563_s0 + %s3058_s22]]   ;;  %s3062_s22 = smov 28  }
  0x23   :  { %s3230_s20 = sld [smem:[%s3563_s0 + %s3060_s7]]   ;;  %s3064_s7 = smov 30  }
  0x24   :  { %3583 = sst [smem:[#allocation57_spill]] %s3205_s5 }
  0x25   :  { %s3225_s5 = sld [smem:[%s3563_s0 + %s3059_s28]]   ;;  %s3063_s28 = smov 29  }
  0x26   :  { %s3240_s6 = sld [smem:[%s3563_s0 + %s3062_s22]]  }
  0x27   :  { %3584 = sst [smem:[#allocation58_spill]] %s3215_s29 }
  0x28   :  { %s3235_s29 = sld [smem:[%s3563_s0 + %s3061_s15]]   ;;  %s3065_s15 = smov 31  }
  0x29   :  { %3586 = sst [smem:[#allocation60_spill]] %s3230_s20 }
  0x2a   :  { %s3250_s20 = sld [smem:[%s3563_s0 + %s3064_s7]]  }
  0x2b   :  { %3585 = sst [smem:[#allocation59_spill]] %s3225_s5 }
  0x2c   :  { %s3245_s5 = sld [smem:[%s3563_s0 + %s3063_s28]]  }
  0x2e   :  { %3587 = sst [smem:[#allocation61_spill]] %s3235_s29 }
  0x2f   :  { %s3255_s29 = sld [smem:[%s3563_s0 + %s3065_s15]]  }
  0x30   :  { %69 = vsyncpa [#allocation3], 0 }
  0x31   :  { %70 = vsyncpa [#allocation6], 0 }
  0x32   :  { %71 = vsyncpa [#allocation9], 0 }
  0x33   :  { %72 = vsyncpa [#allocation12], 0 }
  0x34   :  { %73 = vsyncpa [#allocation15], 0 }
  0x35   :  { %74 = vsyncpa [#allocation18], 0 }
  0x36   :  { %75 = vsyncpa [#allocation21], 0 }
  0x37   :  { %76 = vsyncpa [#allocation24], 0 }
  0x38   :  { %77 = vsyncpa [#allocation27], 0 }
  0x39   :  { %78 = vsyncpa [#allocation30], 0 }
  0x3a   :  { %79 = vsyncpa [#allocation33], 0 }
  0x3b   :  { %80 = vsyncpa [#allocation4], 0  ;;  %s3066_s22 = smov [#allocation5]   ;;  %s3067_s26 = smov [#allocation8]  }
  0x3c   :  { %s105_s23 = sshll.u32 %s3066_s22, 4  ;;  %s126_s0 = sshll.u32 %s3067_s26, 4  ;;  %s106_s23 = int_to_ptr.vmem [resolvable:$true] %s105_s23  ;;  %s3257_s0 = int_to_ptr.vmem [resolvable:$true] %s126_s0 }
  0x3d   :  { %s2527_s28 = scalar_lea.hbm %s3125_s25, 16 }
  0x3e   :  { %p2528_p0 = scmp.ne.s32.totalorder %s3125_s25, %s2527_s28  ;;  %p2531_p1 = scmp.lt.u32.totalorder %s2527_s28, %s3125_s25 }
  0x40   :  { %p2533_p2 = pnand %p2531_p1, %p2528_p0 }
  0x42   :  { %2536 = shalt.err (!%p2533_p2)
}
  0x43   :  { %s2537_s1 = scalar_lea.vmem %s106_s23, 16  ;;  %s2541_s2 = scalar_lea.vmem %s106_s23, 32 }
  0x44   :  { %p2538_p3 = scmp.ne.s32.totalorder %s106_s23, %s2537_s1  ;;  %p2542_p4 = scmp.lt.s32.totalorder %s106_s23, %s106_s23 }
  0x45   :  { %p2543_p5 = scmp.lt.s32.totalorder %s2541_s2, %s2537_s1 }
  0x47   :  { %p2544_p6 = por %p2543_p5, %p2542_p4 }
  0x49   :  { %p2545_p7 = pnand %p2544_p6, %p2538_p3 }
  0x4b   :  { %2548 = shalt.err (!%p2545_p7)
}
  0x4c   :  { %108 = dma.hbm_to_vmem [thread:$0]  %s3125_s25, 16, %s106_s23, [#allocation6]  }
  0x4d   :  { %s2549_s7 = scalar_lea.hbm %s3140_s8, 1024 }
  0x4e   :  { %p2550_p8 = scmp.ne.s32.totalorder %s3140_s8, %s2549_s7  ;;  %p2553_p9 = scmp.lt.u32.totalorder %s2549_s7, %s3140_s8 }
  0x50   :  { %p2555_p10 = pnand %p2553_p9, %p2550_p8 }
  0x52   :  { %2558 = shalt.err (!%p2555_p10)
}
  0x53   :  { %s2559_s10 = scalar_lea.vmem %s3257_s0, 1024  ;;  %p2564_p12 = scmp.lt.s32.totalorder %s3257_s0, %s3257_s0 }
  0x54   :  { %p2560_p11 = scmp.ne.s32.totalorder %s3257_s0, %s2559_s10  ;;  %p2565_p13 = scmp.lt.s32.totalorder %s2559_s10, %s2559_s10 }
  0x56   :  { %p2566_p0 = por %p2565_p13, %p2564_p12 }
  0x58   :  { %p2567_p1 = pnand %p2566_p0, %p2560_p11 }
  0x5a   :  { %2570 = shalt.err (!%p2567_p1)
}
  0x5b   :  { %s3068_s11 = smov 64   ;;  %s3069_s25 = smov 4  }
  0x5c   :  { %132 = dma.hbm_to_vmem [thread:$0]  %s3140_s8, 1024, %s3257_s0, [#allocation9], %s3068_s11, %s3068_s11, %s3069_s25  }
  0x5d   :  { %s3070_s15 = smov [#allocation11]   ;;  %s3071_s18 = smov [#allocation14]  }
  0x5e   :  { %s148_s16 = sshll.u32 %s3070_s15, 4  ;;  %s170_s22 = sshll.u32 %s3071_s18, 4  ;;  %s149_s16 = int_to_ptr.vmem [resolvable:$true] %s148_s16  ;;  %s3275_s22 = int_to_ptr.vmem [resolvable:$true] %s170_s22 }
  0x5f   :  { %s2571_s23 = scalar_lea.hbm %s3150_s19, 1024 }
  0x60   :  { %p2572_p2 = scmp.ne.s32.totalorder %s3150_s19, %s2571_s23  ;;  %p2575_p3 = scmp.lt.u32.totalorder %s2571_s23, %s3150_s19 }
  0x62   :  { %p2577_p4 = pnand %p2575_p3, %p2572_p2 }
  0x64   :  { %2580 = shalt.err (!%p2577_p4)
}
  0x65   :  { %s2581_s26 = scalar_lea.vmem %s149_s16, 1024  ;;  %p2586_p6 = scmp.lt.s32.totalorder %s149_s16, %s149_s16 }
  0x66   :  { %p2582_p5 = scmp.ne.s32.totalorder %s149_s16, %s2581_s26  ;;  %p2587_p7 = scmp.lt.s32.totalorder %s2581_s26, %s2581_s26 }
  0x68   :  { %p2588_p8 = por %p2587_p7, %p2586_p6 }
  0x6a   :  { %p2589_p9 = pnand %p2588_p8, %p2582_p5 }
  0x6c   :  { %2592 = shalt.err (!%p2589_p9)
}
  0x6d   :  { %154 = dma.hbm_to_vmem [thread:$0]  %s3150_s19, 1024, %s149_s16, [#allocation12], %s3068_s11, %s3068_s11, %s3069_s25  }
  0x6e   :  { %s2593_s8 = scalar_lea.hbm %s3160_s30, 1024 }
  0x6f   :  { %p2594_p10 = scmp.ne.s32.totalorder %s3160_s30, %s2593_s8  ;;  %p2597_p11 = scmp.lt.u32.totalorder %s2593_s8, %s3160_s30 }
  0x71   :  { %p2599_p12 = pnand %p2597_p11, %p2594_p10 }
  0x73   :  { %2602 = shalt.err (!%p2599_p12)
}
  0x74   :  { %s2603_s0 = scalar_lea.vmem %s3275_s22, 1024  ;;  %p2608_p0 = scmp.lt.s32.totalorder %s3275_s22, %s3275_s22 }
  0x75   :  { %p2604_p13 = scmp.ne.s32.totalorder %s3275_s22, %s2603_s0  ;;  %p2609_p1 = scmp.lt.s32.totalorder %s2603_s0, %s2603_s0 }
  0x77   :  { %p2610_p2 = por %p2609_p1, %p2608_p0 }
  0x79   :  { %p2611_p3 = pnand %p2610_p2, %p2604_p13 }
  0x7b   :  { %2614 = shalt.err (!%p2611_p3)
}
  0x7c   :  { %176 = dma.hbm_to_vmem [thread:$0]  %s3160_s30, 1024, %s3275_s22, [#allocation15], %s3068_s11, %s3068_s11, %s3069_s25  }
  0x7d   :  { %s3072_s19 = smov [#allocation17]   ;;  %s3073_s1 = smov [#allocation20]  }
  0x7e   :  { %s192_s28 = sshll.u32 %s3072_s19, 4  ;;  %s214_s2 = sshll.u32 %s3073_s1, 4  ;;  %s193_s28 = int_to_ptr.vmem [resolvable:$true] %s192_s28  ;;  %s3296_s2 = int_to_ptr.vmem [resolvable:$true] %s214_s2 }
  0x7f   :  { %s2615_s7 = scalar_lea.hbm %s3170_s12, 1024 }
  0x80   :  { %p2616_p4 = scmp.ne.s32.totalorder %s3170_s12, %s2615_s7  ;;  %p2619_p5 = scmp.lt.u32.totalorder %s2615_s7, %s3170_s12 }
  0x82   :  { %p2621_p6 = pnand %p2619_p5, %p2616_p4 }
  0x84   :  { %2624 = shalt.err (!%p2621_p6)
}
  0x85   :  { %s2625_s10 = scalar_lea.vmem %s193_s28, 1024  ;;  %p2630_p8 = scmp.lt.s32.totalorder %s193_s28, %s193_s28 }
  0x86   :  { %p2626_p7 = scmp.ne.s32.totalorder %s193_s28, %s2625_s10  ;;  %p2631_p9 = scmp.lt.s32.totalorder %s2625_s10, %s2625_s10 }
  0x88   :  { %p2632_p10 = por %p2631_p9, %p2630_p8 }
  0x8a   :  { %p2633_p11 = pnand %p2632_p10, %p2626_p7 }
  0x8c   :  { %2636 = shalt.err (!%p2633_p11)
}
  0x8d   :  { %198 = dma.hbm_to_vmem [thread:$0]  %s3170_s12, 1024, %s193_s28, [#allocation18], %s3068_s11, %s3068_s11, %s3069_s25  }
  0x8e   :  { %s2637_s30 = scalar_lea.hbm %s3180_s27, 1024 }
  0x8f   :  { %p2638_p12 = scmp.ne.s32.totalorder %s3180_s27, %s2637_s30  ;;  %p2641_p13 = scmp.lt.u32.totalorder %s2637_s30, %s3180_s27 }
  0x91   :  { %p2643_p0 = pnand %p2641_p13, %p2638_p12 }
  0x93   :  { %2646 = shalt.err (!%p2643_p0)
}
  0x94   :  { %s2647_s15 = scalar_lea.vmem %s3296_s2, 1024  ;;  %p2652_p2 = scmp.lt.s32.totalorder %s3296_s2, %s3296_s2 }
  0x95   :  { %p2648_p1 = scmp.ne.s32.totalorder %s3296_s2, %s2647_s15  ;;  %p2653_p3 = scmp.lt.s32.totalorder %s2647_s15, %s2647_s15 }
  0x97   :  { %p2654_p4 = por %p2653_p3, %p2652_p2 }
  0x99   :  { %p2655_p5 = pnand %p2654_p4, %p2648_p1 }
  0x9b   :  { %2658 = shalt.err (!%p2655_p5)
}
  0x9c   :  { %220 = dma.hbm_to_vmem [thread:$0]  %s3180_s27, 1024, %s3296_s2, [#allocation21], %s3068_s11, %s3068_s11, %s3069_s25  }
  0x9d   :  { %s3074_s12 = smov [#allocation23]   ;;  %s3075_s18 = smov [#allocation26]  }
  0x9e   :  { %s236_s16 = sshll.u32 %s3074_s12, 4  ;;  %s258_s22 = sshll.u32 %s3075_s18, 4  ;;  %s237_s16 = int_to_ptr.vmem [resolvable:$true] %s236_s16  ;;  %s3317_s22 = int_to_ptr.vmem [resolvable:$true] %s258_s22 }
  0x9f   :  { %s2659_s23 = scalar_lea.hbm %s3190_s9, 1024 }
  0xa0   :  { %p2660_p6 = scmp.ne.s32.totalorder %s3190_s9, %s2659_s23  ;;  %p2663_p7 = scmp.lt.u32.totalorder %s2659_s23, %s3190_s9 }
  0xa2   :  { %p2665_p8 = pnand %p2663_p7, %p2660_p6 }
  0xa4   :  { %2668 = shalt.err (!%p2665_p8)
}
  0xa5   :  { %s2669_s26 = scalar_lea.vmem %s237_s16, 1024  ;;  %p2674_p10 = scmp.lt.s32.totalorder %s237_s16, %s237_s16 }
  0xa6   :  { %p2670_p9 = scmp.ne.s32.totalorder %s237_s16, %s2669_s26  ;;  %p2675_p11 = scmp.lt.s32.totalorder %s2669_s26, %s2669_s26 }
  0xa8   :  { %p2676_p12 = por %p2675_p11, %p2674_p10 }
  0xaa   :  { %p2677_p13 = pnand %p2676_p12, %p2670_p9 }
  0xac   :  { %2680 = shalt.err (!%p2677_p13)
}
  0xad   :  { %242 = dma.hbm_to_vmem [thread:$0]  %s3190_s9, 1024, %s237_s16, [#allocation24], %s3068_s11, %s3068_s11, %s3069_s25  }
  0xae   :  { %s2681_s27 = scalar_lea.hbm %s3200_s21, 1024 }
  0xaf   :  { %p2682_p0 = scmp.ne.s32.totalorder %s3200_s21, %s2681_s27  ;;  %p2685_p1 = scmp.lt.u32.totalorder %s2681_s27, %s3200_s21 }
  0xb1   :  { %p2687_p2 = pnand %p2685_p1, %p2682_p0 }
  0xb3   :  { %2690 = shalt.err (!%p2687_p2)
}
  0xb4   :  { %s2691_s8 = scalar_lea.vmem %s3317_s22, 1024  ;;  %p2696_p4 = scmp.lt.s32.totalorder %s3317_s22, %s3317_s22 }
  0xb5   :  { %p2692_p3 = scmp.ne.s32.totalorder %s3317_s22, %s2691_s8  ;;  %p2697_p5 = scmp.lt.s32.totalorder %s2691_s8, %s2691_s8 }
  0xb7   :  { %p2698_p6 = por %p2697_p5, %p2696_p4 }
  0xb9   :  { %p2699_p7 = pnand %p2698_p6, %p2692_p3 }
  0xbb   :  { %2702 = shalt.err (!%p2699_p7)
}
  0xbc   :  { %264 = dma.hbm_to_vmem [thread:$0]  %s3200_s21, 1024, %s3317_s22, [#allocation27], %s3068_s11, %s3068_s11, %s3069_s25  }
  0xbd   :  { %s3076_s9 = smov [#allocation29]   ;;  %s3077_s19 = smov [#allocation32]  }
  0xbe   :  { %s280_s0 = sshll.u32 %s3076_s9, 4  ;;  %s302_s28 = sshll.u32 %s3077_s19, 4  ;;  %s281_s0 = int_to_ptr.vmem [resolvable:$true] %s280_s0  ;;  %s3338_s28 = int_to_ptr.vmem [resolvable:$true] %s302_s28 }
  0xbf   :  { %s2703_s1 = scalar_lea.hbm %s3210_s13, 1024 }
  0xc0   :  { %p2704_p8 = scmp.ne.s32.totalorder %s3210_s13, %s2703_s1  ;;  %p2707_p9 = scmp.lt.u32.totalorder %s2703_s1, %s3210_s13 }
  0xc2   :  { %p2709_p10 = pnand %p2707_p9, %p2704_p8 }
  0xc4   :  { %2712 = shalt.err (!%p2709_p10)
}
  0xc5   :  { %s2713_s2 = scalar_lea.vmem %s281_s0, 1024  ;;  %p2718_p12 = scmp.lt.s32.totalorder %s281_s0, %s281_s0 }
  0xc6   :  { %p2714_p11 = scmp.ne.s32.totalorder %s281_s0, %s2713_s2  ;;  %p2719_p13 = scmp.lt.s32.totalorder %s2713_s2, %s2713_s2 }
  0xc8   :  { %p2720_p0 = por %p2719_p13, %p2718_p12 }
  0xca   :  { %p2721_p1 = pnand %p2720_p0, %p2714_p11 }
  0xcc   :  { %2724 = shalt.err (!%p2721_p1)
}
  0xcd   :  { %286 = dma.hbm_to_vmem [thread:$0]  %s3210_s13, 1024, %s281_s0, [#allocation30], %s3068_s11, %s3068_s11, %s3069_s25  }
  0xce   :  { %s2725_s21 = scalar_lea.hbm %s3220_s4, 1024 }
  0xcf   :  { %p2726_p2 = scmp.ne.s32.totalorder %s3220_s4, %s2725_s21  ;;  %p2729_p3 = scmp.lt.u32.totalorder %s2725_s21, %s3220_s4 }
  0xd1   :  { %p2731_p4 = pnand %p2729_p3, %p2726_p2 }
  0xd3   :  { %2734 = shalt.err (!%p2731_p4)
}
  0xd4   :  { %s2735_s7 = scalar_lea.vmem %s3338_s28, 1024  ;;  %p2740_p6 = scmp.lt.s32.totalorder %s3338_s28, %s3338_s28 }
  0xd5   :  { %p2736_p5 = scmp.ne.s32.totalorder %s3338_s28, %s2735_s7  ;;  %p2741_p7 = scmp.lt.s32.totalorder %s2735_s7, %s2735_s7 }
  0xd7   :  { %p2742_p8 = por %p2741_p7, %p2740_p6 }
  0xd9   :  { %p2743_p9 = pnand %p2742_p8, %p2736_p5 }
  0xdb   :  { %2746 = shalt.err (!%p2743_p9)
}
  0xdc   :  { %308 = dma.hbm_to_vmem [thread:$0]  %s3220_s4, 1024, %s3338_s28, [#allocation33], %s3068_s11, %s3068_s11, %s3069_s25  }
  0xdd   :  { %s3078_s13 = smov [#allocation2]   ;;  %s3079_s30 = smov [#allocation7]  }
  0xde   :  { %s93_s10 = sshll.u32 %s3078_s13, 4  ;;  %s117_s15 = sshll.u32 %s3079_s30, 4  ;;  %s94_s10 = int_to_ptr.vmem [resolvable:$true] %s93_s10  ;;  %s118_s15 = int_to_ptr.vmem [resolvable:$true] %s117_s15 }
  0xdf   :  { %s2747_s12 = scalar_lea.hbm %s3115_s17, 16 }
  0xe0   :  { %p2748_p10 = scmp.ne.s32.totalorder %s3115_s17, %s2747_s12  ;;  %p2751_p11 = scmp.lt.u32.totalorder %s2747_s12, %s3115_s17 }
  0xe2   :  { %p2753_p12 = pnand %p2751_p11, %p2748_p10 }
  0xe4   :  { %2756 = shalt.err (!%p2753_p12)
}
  0xe5   :  { %s2757_s16 = scalar_lea.vmem %s94_s10, 16  ;;  %s2761_s18 = scalar_lea.vmem %s94_s10, 32 }
  0xe6   :  { %p2758_p13 = scmp.ne.s32.totalorder %s94_s10, %s2757_s16  ;;  %p2762_p0 = scmp.lt.s32.totalorder %s94_s10, %s94_s10 }
  0xe7   :  { %p2763_p1 = scmp.lt.s32.totalorder %s2761_s18, %s2757_s16 }
  0xe9   :  { %p2764_p2 = por %p2763_p1, %p2762_p0 }
  0xeb   :  { %p2765_p3 = pnand %p2764_p2, %p2758_p13 }
  0xed   :  { %2768 = shalt.err (!%p2765_p3)
}
  0xee   :  { %96 = dma.hbm_to_vmem [thread:$0]  %s3115_s17, 16, %s94_s10, [#allocation3]  }
  0xef   :  { %s2769_s4 = scalar_lea.hbm %s3135_s3, 16 }
  0xf0   :  { %p2770_p4 = scmp.ne.s32.totalorder %s3135_s3, %s2769_s4  ;;  %p2773_p5 = scmp.lt.u32.totalorder %s2769_s4, %s3135_s3 }
  0xf2   :  { %p2775_p6 = pnand %p2773_p5, %p2770_p4 }
  0xf4   :  { %2778 = shalt.err (!%p2775_p6)
}
  0xf5   :  { %s2779_s11 = scalar_lea.vmem %s118_s15, 16  ;;  %s2783_s25 = scalar_lea.vmem %s118_s15, 32 }
  0xf6   :  { %p2780_p7 = scmp.ne.s32.totalorder %s118_s15, %s2779_s11  ;;  %p2784_p8 = scmp.lt.s32.totalorder %s118_s15, %s118_s15 }
  0xf7   :  { %p2785_p9 = scmp.lt.s32.totalorder %s2783_s25, %s2779_s11 }
  0xf9   :  { %p2786_p10 = por %p2785_p9, %p2784_p8 }
  0xfb   :  { %p2787_p11 = pnand %p2786_p10, %p2780_p7 }
  0xfd   :  { %2790 = shalt.err (!%p2787_p11)
}
  0xfe   :  { %120 = dma.hbm_to_vmem [thread:$0]  %s3135_s3, 16, %s118_s15, [#allocation6]  }
  0xff   :  { %s3080_s22 = smov [#allocation10]   ;;  %s3081_s23 = smov [#allocation13]  }
 0x100   :  { %s139_s17 = sshll.u32 %s3080_s22, 4  ;;  %s161_s26 = sshll.u32 %s3081_s23, 4  ;;  %s140_s17 = int_to_ptr.vmem [resolvable:$true] %s139_s17  ;;  %s162_s26 = int_to_ptr.vmem [resolvable:$true] %s161_s26 }
 0x101   :  { %s2791_s27 = scalar_lea.hbm %s3145_s14, 16 }
 0x102   :  { %p2792_p12 = scmp.ne.s32.totalorder %s3145_s14, %s2791_s27  ;;  %p2795_p13 = scmp.lt.u32.totalorder %s2791_s27, %s3145_s14 }
 0x104   :  { %p2797_p0 = pnand %p2795_p13, %p2792_p12 }
 0x106   :  { %2800 = shalt.err (!%p2797_p0)
}
 0x107   :  { %s2801_s8 = scalar_lea.vmem %s140_s17, 16  ;;  %s2805_s9 = scalar_lea.vmem %s140_s17, 32 }
 0x108   :  { %p2802_p1 = scmp.ne.s32.totalorder %s140_s17, %s2801_s8  ;;  %p2806_p2 = scmp.lt.s32.totalorder %s140_s17, %s140_s17 }
 0x109   :  { %p2807_p3 = scmp.lt.s32.totalorder %s2805_s9, %s2801_s8 }
 0x10b   :  { %p2808_p4 = por %p2807_p3, %p2806_p2 }
 0x10d   :  { %p2809_p5 = pnand %p2808_p4, %p2802_p1 }
 0x10f   :  { %2812 = shalt.err (!%p2809_p5)
}
 0x110   :  { %142 = dma.hbm_to_vmem [thread:$0]  %s3145_s14, 16, %s140_s17, [#allocation9]  }
 0x111   :  { %s2813_s3 = scalar_lea.hbm %s3155_s24, 16 }
 0x112   :  { %p2814_p6 = scmp.ne.s32.totalorder %s3155_s24, %s2813_s3  ;;  %p2817_p7 = scmp.lt.u32.totalorder %s2813_s3, %s3155_s24 }
 0x114   :  { %p2819_p8 = pnand %p2817_p7, %p2814_p6 }
 0x116   :  { %2822 = shalt.err (!%p2819_p8)
}
 0x117   :  { %s2823_s0 = scalar_lea.vmem %s162_s26, 16  ;;  %s2827_s19 = scalar_lea.vmem %s162_s26, 32 }
 0x118   :  { %p2824_p9 = scmp.ne.s32.totalorder %s162_s26, %s2823_s0  ;;  %p2828_p10 = scmp.lt.s32.totalorder %s162_s26, %s162_s26 }
 0x119   :  { %p2829_p11 = scmp.lt.s32.totalorder %s2827_s19, %s2823_s0 }
 0x11b   :  { %p2830_p12 = por %p2829_p11, %p2828_p10 }
 0x11d   :  { %p2831_p13 = pnand %p2830_p12, %p2824_p9 }
 0x11f   :  { %2834 = shalt.err (!%p2831_p13)
}
 0x120   :  { %s3588_s28 = sld [smem:[#allocation53_spill]]  ;;  %s3082_s1 = smov [#allocation16]  }
 0x121   :  { %164 = dma.hbm_to_vmem [thread:$0]  %s3155_s24, 16, %s162_s26, [#allocation12]  }
 0x122   :  { %s183_s14 = sshll.u32 %s3082_s1, 4  ;;  %s3083_s2 = smov [#allocation19]   ;;  %s184_s14 = int_to_ptr.vmem [resolvable:$true] %s183_s14 }
 0x123   :  { %s205_s21 = sshll.u32 %s3083_s2, 4  ;;  %s206_s21 = int_to_ptr.vmem [resolvable:$true] %s205_s21 }
 0x126   :  { %s2835_s7 = scalar_lea.hbm %s3588_s28, 16 }
 0x127   :  { %p2836_p0 = scmp.ne.s32.totalorder %s3588_s28, %s2835_s7  ;;  %p2839_p1 = scmp.lt.u32.totalorder %s2835_s7, %s3588_s28 }
 0x129   :  { %p2841_p2 = pnand %p2839_p1, %p2836_p0 }
 0x12b   :  { %2844 = shalt.err (!%p2841_p2)
}
 0x12c   :  { %s2845_s13 = scalar_lea.vmem %s184_s14, 16  ;;  %s2849_s10 = scalar_lea.vmem %s184_s14, 32 }
 0x12d   :  { %p2846_p3 = scmp.ne.s32.totalorder %s184_s14, %s2845_s13  ;;  %p2850_p4 = scmp.lt.s32.totalorder %s184_s14, %s184_s14 }
 0x12e   :  { %p2851_p5 = scmp.lt.s32.totalorder %s2849_s10, %s2845_s13 }
 0x130   :  { %p2852_p6 = por %p2851_p5, %p2850_p4 }
 0x132   :  { %p2853_p7 = pnand %p2852_p6, %p2846_p3 }
 0x134   :  { %2856 = shalt.err (!%p2853_p7)
}
 0x135   :  { %s3589_s24 = sld [smem:[#allocation54_spill]] }
 0x136   :  { %186 = dma.hbm_to_vmem [thread:$0]  %s3588_s28, 16, %s184_s14, [#allocation15]  }
 0x13b   :  { %s2857_s30 = scalar_lea.hbm %s3589_s24, 16 }
 0x13c   :  { %p2858_p8 = scmp.ne.s32.totalorder %s3589_s24, %s2857_s30  ;;  %p2861_p9 = scmp.lt.u32.totalorder %s2857_s30, %s3589_s24 }
 0x13e   :  { %p2863_p10 = pnand %p2861_p9, %p2858_p8 }
 0x140   :  { %2866 = shalt.err (!%p2863_p10)
}
 0x141   :  { %s2867_s15 = scalar_lea.vmem %s206_s21, 16  ;;  %s2871_s12 = scalar_lea.vmem %s206_s21, 32 }
 0x142   :  { %p2868_p11 = scmp.ne.s32.totalorder %s206_s21, %s2867_s15  ;;  %p2872_p12 = scmp.lt.s32.totalorder %s206_s21, %s206_s21 }
 0x143   :  { %p2873_p13 = scmp.lt.s32.totalorder %s2871_s12, %s2867_s15 }
 0x145   :  { %p2874_p0 = por %p2873_p13, %p2872_p12 }
 0x147   :  { %p2875_p1 = pnand %p2874_p0, %p2868_p11 }
 0x149   :  { %2878 = shalt.err (!%p2875_p1)
}
 0x14a   :  { %s3590_s16 = sld [smem:[#allocation55_spill]]  ;;  %s3084_s18 = smov [#allocation22]  }
 0x14b   :  { %208 = dma.hbm_to_vmem [thread:$0]  %s3589_s24, 16, %s206_s21, [#allocation18]  }
 0x14c   :  { %s227_s4 = sshll.u32 %s3084_s18, 4  ;;  %s3085_s11 = smov [#allocation25]   ;;  %s228_s4 = int_to_ptr.vmem [resolvable:$true] %s227_s4 }
 0x14d   :  { %s249_s25 = sshll.u32 %s3085_s11, 4  ;;  %s250_s25 = int_to_ptr.vmem [resolvable:$true] %s249_s25 }
 0x150   :  { %s2879_s22 = scalar_lea.hbm %s3590_s16, 16 }
 0x151   :  { %p2880_p2 = scmp.ne.s32.totalorder %s3590_s16, %s2879_s22  ;;  %p2883_p3 = scmp.lt.u32.totalorder %s2879_s22, %s3590_s16 }
 0x153   :  { %p2885_p4 = pnand %p2883_p3, %p2880_p2 }
 0x155   :  { %2888 = shalt.err (!%p2885_p4)
}
 0x156   :  { %s2889_s17 = scalar_lea.vmem %s228_s4, 16  ;;  %s2893_s23 = scalar_lea.vmem %s228_s4, 32 }
 0x157   :  { %p2890_p5 = scmp.ne.s32.totalorder %s228_s4, %s2889_s17  ;;  %p2894_p6 = scmp.lt.s32.totalorder %s228_s4, %s228_s4 }
 0x158   :  { %p2895_p7 = scmp.lt.s32.totalorder %s2893_s23, %s2889_s17 }
 0x15a   :  { %p2896_p8 = por %p2895_p7, %p2894_p6 }
 0x15c   :  { %p2897_p9 = pnand %p2896_p8, %p2890_p5 }
 0x15e   :  { %2900 = shalt.err (!%p2897_p9)
}
 0x15f   :  { %s3591_s26 = sld [smem:[#allocation56_spill]] }
 0x160   :  { %230 = dma.hbm_to_vmem [thread:$0]  %s3590_s16, 16, %s228_s4, [#allocation21]  }
 0x165   :  { %s2901_s27 = scalar_lea.hbm %s3591_s26, 16 }
 0x166   :  { %p2902_p10 = scmp.ne.s32.totalorder %s3591_s26, %s2901_s27  ;;  %p2905_p11 = scmp.lt.u32.totalorder %s2901_s27, %s3591_s26 }
 0x168   :  { %p2907_p12 = pnand %p2905_p11, %p2902_p10 }
 0x16a   :  { %2910 = shalt.err (!%p2907_p12)
}
 0x16b   :  { %s2911_s8 = scalar_lea.vmem %s250_s25, 16  ;;  %s2915_s9 = scalar_lea.vmem %s250_s25, 32 }
 0x16c   :  { %p2912_p13 = scmp.ne.s32.totalorder %s250_s25, %s2911_s8  ;;  %p2916_p0 = scmp.lt.s32.totalorder %s250_s25, %s250_s25 }
 0x16d   :  { %p2917_p1 = scmp.lt.s32.totalorder %s2915_s9, %s2911_s8 }
 0x16f   :  { %p2918_p2 = por %p2917_p1, %p2916_p0 }
 0x171   :  { %p2919_p3 = pnand %p2918_p2, %p2912_p13 }
 0x173   :  { %2922 = shalt.err (!%p2919_p3)
}
 0x174   :  { %s3592_s3 = sld [smem:[#allocation57_spill]]  ;;  %s3086_s0 = smov [#allocation28]  }
 0x175   :  { %252 = dma.hbm_to_vmem [thread:$0]  %s3591_s26, 16, %s250_s25, [#allocation24]  }
 0x176   :  { %s271_s19 = sshll.u32 %s3086_s0, 4  ;;  %s3087_s28 = smov [#allocation31]   ;;  %s272_s19 = int_to_ptr.vmem [resolvable:$true] %s271_s19 }
 0x177   :  { %s293_s1 = sshll.u32 %s3087_s28, 4  ;;  %s294_s1 = int_to_ptr.vmem [resolvable:$true] %s293_s1 }
 0x17a   :  { %s2923_s14 = scalar_lea.hbm %s3592_s3, 16 }
 0x17b   :  { %p2924_p4 = scmp.ne.s32.totalorder %s3592_s3, %s2923_s14  ;;  %p2927_p5 = scmp.lt.u32.totalorder %s2923_s14, %s3592_s3 }
 0x17d   :  { %p2929_p6 = pnand %p2927_p5, %p2924_p4 }
 0x17f   :  { %2932 = shalt.err (!%p2929_p6)
}
 0x180   :  { %s2933_s2 = scalar_lea.vmem %s272_s19, 16  ;;  %s2937_s21 = scalar_lea.vmem %s272_s19, 32 }
 0x181   :  { %p2934_p7 = scmp.ne.s32.totalorder %s272_s19, %s2933_s2  ;;  %p2938_p8 = scmp.lt.s32.totalorder %s272_s19, %s272_s19 }
 0x182   :  { %p2939_p9 = scmp.lt.s32.totalorder %s2937_s21, %s2933_s2 }
 0x184   :  { %p2940_p10 = por %p2939_p9, %p2938_p8 }
 0x186   :  { %p2941_p11 = pnand %p2940_p10, %p2934_p7 }
 0x188   :  { %2944 = shalt.err (!%p2941_p11)
}
 0x189   :  { %s3593_s7 = sld [smem:[#allocation58_spill]] }
 0x18a   :  { %274 = dma.hbm_to_vmem [thread:$0]  %s3592_s3, 16, %s272_s19, [#allocation27]  }
 0x18f   :  { %s2945_s13 = scalar_lea.hbm %s3593_s7, 16 }
 0x190   :  { %p2946_p12 = scmp.ne.s32.totalorder %s3593_s7, %s2945_s13  ;;  %p2949_p13 = scmp.lt.u32.totalorder %s2945_s13, %s3593_s7 }
 0x192   :  { %p2951_p0 = pnand %p2949_p13, %p2946_p12 }
 0x194   :  { %2954 = shalt.err (!%p2951_p0)
}
 0x195   :  { %s2955_s10 = scalar_lea.vmem %s294_s1, 16  ;;  %s2959_s24 = scalar_lea.vmem %s294_s1, 32 }
 0x196   :  { %p2956_p1 = scmp.ne.s32.totalorder %s294_s1, %s2955_s10  ;;  %p2960_p2 = scmp.lt.s32.totalorder %s294_s1, %s294_s1 }
 0x197   :  { %p2961_p3 = scmp.lt.s32.totalorder %s2959_s24, %s2955_s10 }
 0x199   :  { %p2962_p4 = por %p2961_p3, %p2960_p2 }
 0x19b   :  { %p2963_p5 = pnand %p2962_p4, %p2956_p1 }
 0x19d   :  { %2966 = shalt.err (!%p2963_p5)
}
 0x19e   :  { %s3594_s30 = sld [smem:[#allocation59_spill]]  ;;  %s3088_s15 = smov [#allocation34]  }
 0x19f   :  { %296 = dma.hbm_to_vmem [thread:$0]  %s3593_s7, 16, %s294_s1, [#allocation30]  }
 0x1a0   :  { %s315_s12 = sshll.u32 %s3088_s15, 4  ;;  %s316_s12 = int_to_ptr.vmem [resolvable:$true] %s315_s12 }
 0x1a4   :  { %s2967_s16 = scalar_lea.hbm %s3594_s30, 16 }
 0x1a5   :  { %p2968_p6 = scmp.ne.s32.totalorder %s3594_s30, %s2967_s16  ;;  %p2971_p7 = scmp.lt.u32.totalorder %s2967_s16, %s3594_s30 }
 0x1a7   :  { %p2973_p8 = pnand %p2971_p7, %p2968_p6 }
 0x1a9   :  { %2976 = shalt.err (!%p2973_p8)
}
 0x1aa   :  { %s2977_s18 = scalar_lea.vmem %s316_s12, 16  ;;  %s2981_s4 = scalar_lea.vmem %s316_s12, 32 }
 0x1ab   :  { %p2978_p9 = scmp.ne.s32.totalorder %s316_s12, %s2977_s18  ;;  %p2982_p10 = scmp.lt.s32.totalorder %s316_s12, %s316_s12 }
 0x1ac   :  { %p2983_p11 = scmp.lt.s32.totalorder %s2981_s4, %s2977_s18 }
 0x1ae   :  { %p2984_p12 = por %p2983_p11, %p2982_p10 }
 0x1b0   :  { %p2985_p13 = pnand %p2984_p12, %p2978_p9 }
 0x1b2   :  { %2988 = shalt.err (!%p2985_p13)
}
 0x1b3   :  { %318 = dma.hbm_to_vmem [thread:$0]  %s3594_s30, 16, %s316_s12, [#allocation33]  }
 0x1b4   :  { %3011 = dma.done.wait [#allocation3], 16  }
 0x1b5   :  { %3012 = vsyncadd [#allocation3], 4294967280 }
 0x1b6   :  { %3013 = dma.done.wait [#allocation6], 32  }
 0x1b7   :  { %3014 = vsyncadd [#allocation6], 4294967264 }
 0x1b8   :  { %3015 = dma.done.wait [#allocation9], 1040  }
 0x1b9   :  { %3016 = vsyncadd [#allocation9], 4294966256 }
 0x1ba   :  { %3017 = dma.done.wait [#allocation12], 1040  }
 0x1bb   :  { %3018 = vsyncadd [#allocation12], 4294966256 }
 0x1bc   :  { %3019 = dma.done.wait [#allocation15], 1040  }
 0x1bd   :  { %3020 = vsyncadd [#allocation15], 4294966256 }
 0x1be   :  { %3021 = dma.done.wait [#allocation18], 1040  }
 0x1bf   :  { %3022 = vsyncadd [#allocation18], 4294966256 }
 0x1c0   :  { %3023 = dma.done.wait [#allocation21], 1040  }
 0x1c1   :  { %3024 = vsyncadd [#allocation21], 4294966256 }
 0x1c2   :  { %3025 = dma.done.wait [#allocation24], 1040  }
 0x1c3   :  { %3026 = vsyncadd [#allocation24], 4294966256 }
 0x1c4   :  { %3027 = dma.done.wait [#allocation27], 1040  }
 0x1c5   :  { %3028 = vsyncadd [#allocation27], 4294966256 }
 0x1c6   :  { %3029 = dma.done.wait [#allocation30], 1040  }
 0x1c7   :  { %3030 = vsyncadd [#allocation30], 4294966256 }
 0x1c8   :  { %3031 = dma.done.wait [#allocation33], 1040  }
 0x1c9   :  { %3032 = vsyncadd [#allocation33], 4294966256  ;;  %s3595_s11 = sld [smem:[#allocation50_spill]]  ;;  %v3089_v0 = vmov 0.0   ;;  %vm3090_vm0 = vmmov 0   ;;  %s3596_s25 = sld [smem:[#allocation48_spill]] }
 0x1ca   :  { %2124 = vmatprep.subr.bf16.mxu0 %v3089_v0  ;;  %2140 = vmatprep.mubr.msk.bf16.mxu0 %vm3090_vm0, %v3089_v0  ;;  %s3597_s22 = sld [smem:[#allocation51_spill]]  ;;  %v1908_v19 = vld [vmem:[#allocation2] ss:$0 sm:$0xff]  ;;  %s3598_s17 = sld [smem:[#allocation52_spill]]  ;;  %v2438_v50 = vld [vmem:[#allocation8] sm:$0xff]   ;;  %v2440_v52 = vld [vmem:[#allocation8 + $0x8] sm:$0xff]  }
 0x1cb   :  { %2144 = vmatprep.subr.bf16.mxu1 %v3089_v0  ;;  %2160 = vmatprep.mubr.msk.bf16.mxu1 %vm3090_vm0, %v3089_v0  ;;  %v2442_v54 = vld [vmem:[#allocation8 + $0x10] sm:$0xff]   ;;  %v2444_v56 = vld [vmem:[#allocation8 + $0x18] sm:$0xff]   ;;  %v2446_v58 = vld [vmem:[#allocation8 + $0x20] sm:$0xff]   ;;  %s3599_s23 = sld [smem:[#allocation61_spill]]  ;;  %s3600_s26 = sld [smem:[#allocation49_spill]] }
 0x1cc   :  { %v2448_v60 = vld [vmem:[#allocation8 + $0x28] sm:$0xff]   ;;  %v2450_v62 = vld [vmem:[#allocation8 + $0x30] sm:$0xff]   ;;  %s3601_s27 = sld [smem:[#allocation60_spill]] }
 0x1cf   :  { %v2421_v1 = vld [vmem:[%s3595_s11] sm:$0xff]   ;;  %v2422_v2 = vld [vmem:[%s3595_s11 + $0x8] sm:$0xff]   ;;  %v2423_v3 = vld [vmem:[%s3595_s11 + $0x10] sm:$0xff]  }
 0x1d0   :  { %2125 = vmatpush3.bf16.msra.mxu0 %v2421_v1  ;;  %v2424_v4 = vld [vmem:[%s3595_s11 + $0x18] sm:$0xff]   ;;  %v2425_v5 = vld [vmem:[%s3595_s11 + $0x20] sm:$0xff]   ;;  %v2426_v6 = vld [vmem:[%s3595_s11 + $0x28] sm:$0xff]  }
 0x1d1   :  { %2126 = vmatprep.subr.bf16.mxu0 %v3089_v0  ;;  %v2427_v7 = vld [vmem:[%s3595_s11 + $0x30] sm:$0xff]   ;;  %v2428_v8 = vld [vmem:[%s3595_s11 + $0x38] sm:$0xff]   ;;  %v383_v9 = vld [vmem:[%s3596_s25] sm:$0xff] }
 0x1d2   :  { %v384_v10 = vpack.c.bf16 %v383_v9, %v383_v9  ;;  %v2429_v11 = vld [vmem:[%s3597_s22] sm:$0xff]   ;;  %v2430_v12 = vld [vmem:[%s3597_s22 + $0x8] sm:$0xff]   ;;  %v2431_v13 = vld [vmem:[%s3597_s22 + $0x10] sm:$0xff]  }
 0x1d3   :  { %2145 = vmatpush3.bf16.msra.mxu1 %v2429_v11  ;;  %v2432_v14 = vld [vmem:[%s3597_s22 + $0x18] sm:$0xff]   ;;  %v2433_v15 = vld [vmem:[%s3597_s22 + $0x20] sm:$0xff]   ;;  %v2434_v16 = vld [vmem:[%s3597_s22 + $0x28] sm:$0xff]  }
 0x1d4   :  { %2127 = vmatpush3.bf16.msra.mxu0 %v2422_v2  ;;  %2146 = vmatprep.subr.bf16.mxu1 %v3089_v0  ;;  %v2435_v17 = vld [vmem:[%s3597_s22 + $0x30] sm:$0xff]   ;;  %v2436_v18 = vld [vmem:[%s3597_s22 + $0x38] sm:$0xff]   ;;  %v2437_v49 = vld [vmem:[%s3598_s17] sm:$0xff]  }
 0x1d5   :  { %2128 = vmatprep.subr.bf16.mxu0 %v3089_v0  ;;  %v2439_v51 = vld [vmem:[%s3598_s17 + $0x8] sm:$0xff]   ;;  %v2441_v53 = vld [vmem:[%s3598_s17 + $0x10] sm:$0xff]   ;;  %v2443_v55 = vld [vmem:[%s3598_s17 + $0x18] sm:$0xff]  }
 0x1d6   :  { %v2445_v57 = vld [vmem:[%s3598_s17 + $0x20] sm:$0xff]   ;;  %v2447_v59 = vld [vmem:[%s3598_s17 + $0x28] sm:$0xff]   ;;  %v2449_v61 = vld [vmem:[%s3598_s17 + $0x30] sm:$0xff]  }
 0x1d7   :  { %2147 = vmatpush3.bf16.msra.mxu1 %v2430_v12  ;;  %v2451_v63 = vld [vmem:[%s3598_s17 + $0x38] sm:$0xff]   ;;  %v1917_v2 = vld [vmem:[#allocation5] ss:$0 sm:$0xff] }
 0x1d8   :  { %2129 = vmatpush3.bf16.msra.mxu0 %v2423_v3  ;;  %2148 = vmatprep.subr.bf16.mxu1 %v3089_v0  ;;  %v2452_v1 = vld [vmem:[#allocation8 + $0x38] sm:$0xff]  }
 0x1d9   :  { %2130 = vmatprep.subr.bf16.mxu0 %v3089_v0 }
 0x1db   :  { %2149 = vmatpush3.bf16.msra.mxu1 %v2431_v13 }
 0x1dc   :  { %2131 = vmatpush3.bf16.msra.mxu0 %v2424_v4  ;;  %2150 = vmatprep.subr.bf16.mxu1 %v3089_v0 }
 0x1dd   :  { %2132 = vmatprep.subr.bf16.mxu0 %v3089_v0 }
 0x1df   :  { %2151 = vmatpush3.bf16.msra.mxu1 %v2432_v14 }
 0x1e0   :  { %2133 = vmatpush3.bf16.msra.mxu0 %v2425_v5  ;;  %2152 = vmatprep.subr.bf16.mxu1 %v3089_v0 }
 0x1e1   :  { %2134 = vmatprep.subr.bf16.mxu0 %v3089_v0 }
 0x1e3   :  { %2153 = vmatpush3.bf16.msra.mxu1 %v2433_v15 }
 0x1e4   :  { %2135 = vmatpush3.bf16.msra.mxu0 %v2426_v6  ;;  %2154 = vmatprep.subr.bf16.mxu1 %v3089_v0 }
 0x1e5   :  { %2136 = vmatprep.subr.bf16.mxu0 %v3089_v0 }
 0x1e7   :  { %2155 = vmatpush3.bf16.msra.mxu1 %v2434_v16 }
 0x1e8   :  { %2137 = vmatpush3.bf16.msra.mxu0 %v2427_v7  ;;  %2156 = vmatprep.subr.bf16.mxu1 %v3089_v0 }
 0x1e9   :  { %2138 = vmatprep.subr.bf16.mxu0 %v3089_v0 }
 0x1eb   :  { %2157 = vmatpush3.bf16.msra.mxu1 %v2435_v17 }
 0x1ec   :  { %2139 = vmatpush3.bf16.msra.mxu0 %v2428_v8  ;;  %2158 = vmatprep.subr.bf16.mxu1 %v3089_v0 }
 0x1ed   :  { %2164 = vmatprep.subr.bf16.mxu0 %v3089_v0 }
 0x1ef   :  { %2141 = vmatmul.mubr.bf16.vlgmr.msra.gmra.mrb[0].mxu0 %v384_v10  ;;  %2159 = vmatpush3.bf16.msra.mxu1 %v2436_v18 }
 0x1f0   :  { %2180 = vmatprep.mubr.msk.bf16.mxu0 %vm3090_vm0, %v3089_v0  ;;  %2184 = vmatprep.subr.bf16.mxu1 %v3089_v0 }
 0x1f1   :  { %2165 = vmatpush3.bf16.msra.mxu0 %v2437_v49 }
 0x1f2   :  { %2166 = vmatprep.subr.bf16.mxu0 %v3089_v0 }
 0x1f5   :  { %2167 = vmatpush3.bf16.msra.mxu0 %v2439_v51 }
 0x1f6   :  { %2168 = vmatprep.subr.bf16.mxu0 %v3089_v0 }
 0x1f9   :  { %2169 = vmatpush3.bf16.msra.mxu0 %v2441_v53 }
 0x1fa   :  { %2170 = vmatprep.subr.bf16.mxu0 %v3089_v0 }
 0x1fd   :  { %2171 = vmatpush3.bf16.msra.mxu0 %v2443_v55 }
 0x1fe   :  { %2172 = vmatprep.subr.bf16.mxu0 %v3089_v0 }
 0x201   :  { %2173 = vmatpush3.bf16.msra.mxu0 %v2445_v57 }
 0x202   :  { %2174 = vmatprep.subr.bf16.mxu0 %v3089_v0 }
 0x205   :  { %2175 = vmatpush3.bf16.msra.mxu0 %v2447_v59  ;;  %v2461_v59 = vld [vmem:[#allocation14] sm:$0xff]  }
 0x206   :  { %2176 = vmatprep.subr.bf16.mxu0 %v3089_v0 }
 0x209   :  { %2177 = vmatpush3.bf16.msra.mxu0 %v2449_v61  ;;  %v2463_v61 = vld [vmem:[#allocation14 + $0x10] sm:$0xff]  }
 0x20a   :  { %2178 = vmatprep.subr.bf16.mxu0 %v3089_v0 }
 0x20d   :  { %2179 = vmatpush3.bf16.msra.mxu0 %v2451_v63  ;;  %v2465_v63 = vld [vmem:[#allocation14 + $0x20] sm:$0xff]  }
 0x20e   :  { %2204 = vmatprep.subr.bf16.mxu0 %v3089_v0 }
 0x2c2   :  { %v490_v20 = vpop.f32.mrb[0].mxu0 }
 0x2c3   :  { %v491_v21 = vadd.f32 %v1908_v19, %v490_v20  ;;  %v2142_v22 = vpop.f32.mrb[1].mxu0 }
 0x2c4   :  { %v493_v23 = vpop.f32.mrb[2].mxu0 }
 0x2c5   :  { %v496_v24 = vrot.slane %v491_v21, 4  ;;  %v503_v25 = vmul.f32 %v491_v21, %v491_v21  ;;  %v2143_v26 = vpop.f32.mrb[3].mxu0 }
 0x2c7   :  { %v497_v27 = vadd.f32 %v496_v24, %v491_v21  ;;  %v504_v28 = vrot.slane %v503_v25, 4 }
 0x2c9   :  { %v498_v29 = vrot.slane %v497_v27, 2  ;;  %v505_v30 = vadd.f32 %v504_v28, %v503_v25 }
 0x2cb   :  { %v499_v31 = vadd.f32 %v498_v29, %v497_v27  ;;  %v506_v32 = vrot.slane %v505_v30, 2 }
 0x2cd   :  { %v507_v33 = vadd.f32 %v506_v32, %v505_v30  ;;  %v500_v34 = vrot.slane %v499_v31, 1 }
 0x2cf   :  { %v508_v35 = vrot.slane %v507_v33, 1  ;;  %v501_v36 = vadd.f32 %v500_v34, %v499_v31  ;;  %v2453_v31 = vld [vmem:[#allocation11] sm:$0xff]   ;;  %v2455_v34 = vld [vmem:[#allocation11 + $0x10] sm:$0xff]  }
 0x2d1   :  { %v509_v37 = vadd.f32 %v508_v35, %v507_v33  ;;  %v502_v38 = vmul.f32 0.125, %v501_v36  ;;  %v2454_v33 = vld [vmem:[#allocation11 + $0x8] sm:$0xff]   ;;  %v2456_v35 = vld [vmem:[#allocation11 + $0x18] sm:$0xff]   ;;  %v2457_v36 = vld [vmem:[#allocation11 + $0x20] sm:$0xff]  }
 0x2d3   :  { %v510_v39 = vmul.f32 0.125, %v509_v37  ;;  %v511_v40 = vmul.f32 %v502_v38, %v502_v38  ;;  %v514_v44 = vsub.f32 %v491_v21, %v502_v38  ;;  %v2458_v37 = vld [vmem:[#allocation11 + $0x28] sm:$0xff]   ;;  %v2459_v38 = vld [vmem:[#allocation11 + $0x30] sm:$0xff]  }
 0x2d5   :  { %v512_v41 = vsub.f32 %v510_v39, %v511_v40  ;;  %v2460_v39 = vld [vmem:[#allocation11 + $0x38] sm:$0xff]  }
 0x2d6   :  { %v1926_v40 = vld [vmem:[#allocation7] ss:$0 sm:$0xff] }
 0x2d7   :  { %v513_v42 = vmax.f32 %v512_v41, 0.0  ;;  %v1935_v41 = vld [vmem:[#allocation10] ss:$0 sm:$0xff] }
 0x2d9   :  { %v515_v43 = vadd.f32 1e-05, %v513_v42 }
 0x2db   :  { %2517 = vrsqrt.f32 %v515_v43 }
 0x2e5   :  { %v2518_v45 = vpop.eup %2517 }
 0x2e6   :  { %v517_v46 = vmul.f32 %v2518_v45, %v514_v44 }
 0x2e8   :  { %v518_v47 = vmax.f32 %v517_v46, 0.0 }
 0x2ea   :  { %v519_v48 = vpack.c.bf16 %v518_v47, %v518_v47 }
 0x2ec   :  { %2161 = vmatmul.mubr.bf16.vlgmr.msra.gmra.mrb[0].mxu1 %v519_v48 }
 0x2ed   :  { %2200 = vmatprep.mubr.msk.bf16.mxu1 %vm3090_vm0, %v3089_v0  ;;  %2185 = vmatpush3.bf16.msra.mxu1 %v2438_v50 }
 0x2ee   :  { %2186 = vmatprep.subr.bf16.mxu1 %v3089_v0 }
 0x2f1   :  { %2187 = vmatpush3.bf16.msra.mxu1 %v2440_v52 }
 0x2f2   :  { %2188 = vmatprep.subr.bf16.mxu1 %v3089_v0 }
 0x2f5   :  { %2189 = vmatpush3.bf16.msra.mxu1 %v2442_v54  ;;  %v877_v54 = vld [vmem:[%s3600_s26] sm:$0xff] }
 0x2f6   :  { %2190 = vmatprep.subr.bf16.mxu1 %v3089_v0 }
 0x2f9   :  { %2191 = vmatpush3.bf16.msra.mxu1 %v2444_v56 }
 0x2fa   :  { %2192 = vmatprep.subr.bf16.mxu1 %v3089_v0 }
 0x2fd   :  { %2193 = vmatpush3.bf16.msra.mxu1 %v2446_v58 }
 0x2fe   :  { %2194 = vmatprep.subr.bf16.mxu1 %v3089_v0 }
 0x301   :  { %2195 = vmatpush3.bf16.msra.mxu1 %v2448_v60  ;;  %v2462_v60 = vld [vmem:[#allocation14 + $0x8] sm:$0xff]  }
 0x302   :  { %2196 = vmatprep.subr.bf16.mxu1 %v3089_v0 }
 0x305   :  { %2197 = vmatpush3.bf16.msra.mxu1 %v2450_v62  ;;  %v2464_v62 = vld [vmem:[#allocation14 + $0x18] sm:$0xff]  }
 0x306   :  { %2198 = vmatprep.subr.bf16.mxu1 %v3089_v0 }
 0x309   :  { %2199 = vmatpush3.bf16.msra.mxu1 %v2452_v1  ;;  %v2466_v1 = vld [vmem:[#allocation14 + $0x28] sm:$0xff]  }
 0x30a   :  { %2224 = vmatprep.subr.bf16.mxu1 %v3089_v0 }
 0x3bf   :  { %v625_v3 = vpop.f32.mrb[0].mxu1 }
 0x3c0   :  { %v626_v4 = vadd.f32 %v1917_v2, %v625_v3  ;;  %v2162_v5 = vpop.f32.mrb[1].mxu1  ;;  %v2467_v2 = vld [vmem:[#allocation14 + $0x30] sm:$0xff]   ;;  %v2468_v3 = vld [vmem:[#allocation14 + $0x38] sm:$0xff]  }
 0x3c1   :  { %v628_v6 = vpop.f32.mrb[2].mxu1 }
 0x3c2   :  { %v631_v7 = vrot.slane %v626_v4, 4  ;;  %v638_v8 = vmul.f32 %v626_v4, %v626_v4  ;;  %v2163_v9 = vpop.f32.mrb[3].mxu1 }
 0x3c4   :  { %v632_v10 = vadd.f32 %v631_v7, %v626_v4  ;;  %v639_v11 = vrot.slane %v638_v8, 4 }
 0x3c6   :  { %v633_v12 = vrot.slane %v632_v10, 2  ;;  %v640_v13 = vadd.f32 %v639_v11, %v638_v8 }
 0x3c8   :  { %v634_v14 = vadd.f32 %v633_v12, %v632_v10  ;;  %v641_v15 = vrot.slane %v640_v13, 2 }
 0x3ca   :  { %v635_v16 = vrot.slane %v634_v14, 1  ;;  %v642_v17 = vadd.f32 %v641_v15, %v640_v13 }
 0x3cc   :  { %v636_v18 = vadd.f32 %v635_v16, %v634_v14  ;;  %v643_v19 = vrot.slane %v642_v17, 1 }
 0x3ce   :  { %v637_v20 = vmul.f32 0.125, %v636_v18  ;;  %v644_v21 = vadd.f32 %v643_v19, %v642_v17 }
 0x3d0   :  { %v645_v22 = vmul.f32 0.125, %v644_v21  ;;  %v646_v23 = vmul.f32 %v637_v20, %v637_v20  ;;  %v649_v27 = vsub.f32 %v626_v4, %v637_v20  ;;  %v1944_v4 = vld [vmem:[#allocation13] ss:$0 sm:$0xff] }
 0x3d2   :  { %v647_v24 = vsub.f32 %v645_v22, %v646_v23 }
 0x3d4   :  { %v648_v25 = vmax.f32 %v647_v24, 0.0 }
 0x3d6   :  { %v650_v26 = vadd.f32 1e-05, %v648_v25 }
 0x3d8   :  { %2519 = vrsqrt.f32 %v650_v26 }
 0x3e2   :  { %v2520_v28 = vpop.eup %2519 }
 0x3e3   :  { %v652_v29 = vmul.f32 %v2520_v28, %v649_v27 }
 0x3e5   :  { %v653_v30 = vmax.f32 %v652_v29, 0.0 }
 0x3e7   :  { %v654_v32 = vpack.c.bf16 %v653_v30, %v653_v30 }
 0x3e9   :  { %2181 = vmatmul.mubr.bf16.vlgmr.msra.gmra.mrb[4].mxu0 %v654_v32  ;;  %2201 = vmatmul.mubr.bf16.vlgmr.msra.gmra.mrb[4].mxu1 %v654_v32 }
 0x3ea   :  { %2205 = vmatpush3.bf16.msra.mxu0 %v2453_v31  ;;  %2220 = vmatprep.mubr.msk.bf16.mxu0 %vm3090_vm0, %v3089_v0 }
 0x3eb   :  { %2206 = vmatprep.subr.bf16.mxu0 %v3089_v0  ;;  %2240 = vmatprep.mubr.msk.bf16.mxu1 %vm3090_vm0, %v3089_v0 }
 0x3ec   :  { %2225 = vmatpush3.bf16.msra.mxu1 %v2461_v59 }
 0x3ed   :  { %2226 = vmatprep.subr.bf16.mxu1 %v3089_v0 }
 0x3ee   :  { %2207 = vmatpush3.bf16.msra.mxu0 %v2454_v33  ;;  %v2469_v33 = vld [vmem:[#allocation20] sm:$0xff]  }
 0x3ef   :  { %2208 = vmatprep.subr.bf16.mxu0 %v3089_v0 }
 0x3f0   :  { %2227 = vmatpush3.bf16.msra.mxu1 %v2462_v60 }
 0x3f1   :  { %2228 = vmatprep.subr.bf16.mxu1 %v3089_v0 }
 0x3f2   :  { %2209 = vmatpush3.bf16.msra.mxu0 %v2455_v34 }
 0x3f3   :  { %2210 = vmatprep.subr.bf16.mxu0 %v3089_v0 }
 0x3f4   :  { %2229 = vmatpush3.bf16.msra.mxu1 %v2463_v61 }
 0x3f5   :  { %2230 = vmatprep.subr.bf16.mxu1 %v3089_v0 }
 0x3f6   :  { %2211 = vmatpush3.bf16.msra.mxu0 %v2456_v35  ;;  %v2470_v35 = vld [vmem:[#allocation20 + $0x8] sm:$0xff]  }
 0x3f7   :  { %2212 = vmatprep.subr.bf16.mxu0 %v3089_v0 }
 0x3f8   :  { %2231 = vmatpush3.bf16.msra.mxu1 %v2464_v62 }
 0x3f9   :  { %2232 = vmatprep.subr.bf16.mxu1 %v3089_v0 }
 0x3fa   :  { %2213 = vmatpush3.bf16.msra.mxu0 %v2457_v36  ;;  %v2471_v36 = vld [vmem:[#allocation20 + $0x10] sm:$0xff]  }
 0x3fb   :  { %2214 = vmatprep.subr.bf16.mxu0 %v3089_v0 }
 0x3fc   :  { %2233 = vmatpush3.bf16.msra.mxu1 %v2465_v63 }
 0x3fd   :  { %2234 = vmatprep.subr.bf16.mxu1 %v3089_v0 }
 0x3fe   :  { %2215 = vmatpush3.bf16.msra.mxu0 %v2458_v37  ;;  %v2472_v37 = vld [vmem:[#allocation20 + $0x18] sm:$0xff]  }
 0x3ff   :  { %2216 = vmatprep.subr.bf16.mxu0 %v3089_v0 }
 0x400   :  { %2235 = vmatpush3.bf16.msra.mxu1 %v2466_v1 }
 0x401   :  { %2236 = vmatprep.subr.bf16.mxu1 %v3089_v0 }
 0x402   :  { %2217 = vmatpush3.bf16.msra.mxu0 %v2459_v38  ;;  %v2473_v38 = vld [vmem:[#allocation20 + $0x20] sm:$0xff]  }
 0x403   :  { %2218 = vmatprep.subr.bf16.mxu0 %v3089_v0 }
 0x404   :  { %2237 = vmatpush3.bf16.msra.mxu1 %v2467_v2 }
 0x405   :  { %2238 = vmatprep.subr.bf16.mxu1 %v3089_v0 }
 0x406   :  { %2219 = vmatpush3.bf16.msra.mxu0 %v2460_v39  ;;  %v2474_v39 = vld [vmem:[#allocation20 + $0x28] sm:$0xff]  }
 0x407   :  { %2244 = vmatprep.subr.bf16.mxu0 %v3089_v0 }
 0x408   :  { %2239 = vmatpush3.bf16.msra.mxu1 %v2468_v3 }
 0x409   :  { %2264 = vmatprep.subr.bf16.mxu1 %v3089_v0 }
 0x4bc   :  { %v760_v42 = vpop.f32.mrb[4].mxu0  ;;  %v871_v43 = vpop.f32.mrb[4].mxu1 }
 0x4bd   :  { %v761_v44 = vadd.f32 %v1926_v40, %v760_v42  ;;  %v872_v45 = vadd.f32 %v1935_v41, %v871_v43  ;;  %v2182_v46 = vpop.f32.mrb[5].mxu0  ;;  %v2202_v47 = vpop.f32.mrb[5].mxu1  ;;  %v2475_v40 = vld [vmem:[#allocation20 + $0x30] sm:$0xff]   ;;  %v2476_v41 = vld [vmem:[#allocation20 + $0x38] sm:$0xff]   ;;  %v2478_v43 = vld [vmem:[#allocation17 + $0x8] sm:$0xff]  }
 0x4be   :  { %v763_v48 = vpop.f32.mrb[6].mxu0  ;;  %v874_v49 = vpop.f32.mrb[6].mxu1  ;;  %v2477_v42 = vld [vmem:[#allocation17] sm:$0xff]   ;;  %v2482_v47 = vld [vmem:[#allocation17 + $0x28] sm:$0xff]  }
 0x4bf   :  { %884 = vst [vmem:[%s3599_s23] sm:$0xff] %v761_v44  ;;  %v878_v50 = vmul.f32 0.5, %v872_v45  ;;  %885 = vst [vmem:[%s3240_s6] sm:$0xff] %v872_v45  ;;  %v2183_v51 = vpop.f32.mrb[7].mxu0  ;;  %v2203_v52 = vpop.f32.mrb[7].mxu1  ;;  %v2480_v45 = vld [vmem:[#allocation17 + $0x18] sm:$0xff]   ;;  %v2481_v46 = vld [vmem:[#allocation17 + $0x20] sm:$0xff]   ;;  %s3091_s6 = smov [#allocation35]  }
 0x4c0   :  { %v2483_v48 = vld [vmem:[#allocation17 + $0x30] sm:$0xff]   ;;  %v2484_v49 = vld [vmem:[#allocation17 + $0x38] sm:$0xff]   ;;  %s1844_s8 = sshll.u32 %s3091_s6, 4  ;;  %s1845_s8 = int_to_ptr.vmem [resolvable:$true] %s1844_s8 }
 0x4c1   :  { %v879_v53 = vmul.f32 1.442695, %v878_v50  ;;  %v1953_v50 = vld [vmem:[#allocation16] ss:$0 sm:$0xff]  ;;  %s2989_s9 = scalar_lea.vmem %s1845_s8, 128  ;;  %p2994_p1 = scmp.lt.s32.totalorder %s1845_s8, %s1845_s8 }
 0x4c2   :  { %p2990_p0 = scmp.ne.s32.totalorder %s1845_s8, %s2989_s9  ;;  %p2995_p2 = scmp.lt.s32.totalorder %s2989_s9, %s2989_s9 }
 0x4c3   :  { %2521 = vpow2.f32 %v879_v53 }
 0x4c4   :  { %p2996_p3 = por %p2995_p2, %p2994_p1 }
 0x4c6   :  { %p2997_p4 = pnand %p2996_p3, %p2990_p0 }
 0x4cd   :  { %v2522_v55 = vpop.eup %2521 }
 0x4ce   :  { %v881_v56 = vmul.f32 %v2522_v55, %v877_v54 }
 0x4d0   :  { %v882_v57 = vadd.f32 %v881_v56, %v761_v44  ;;  %v2479_v44 = vld [vmem:[#allocation17 + $0x10] sm:$0xff]  }
 0x4d2   :  { %883 = vst [vmem:[%s3601_s27] sm:$0xff] %v882_v57  ;;  %v3486_v58 = vpack.c.bf16 %v882_v57, %v882_v57 }
 0x4d4   :  { %2221 = vmatmul.mubr.bf16.vlgmr.msra.gmra.mrb[8].mxu0 %v3486_v58 }
 0x4d5   :  { %2260 = vmatprep.mubr.msk.bf16.mxu0 %vm3090_vm0, %v3089_v0  ;;  %2245 = vmatpush3.bf16.msra.mxu0 %v2477_v42  ;;  %v2501_v42 = vld [vmem:[#allocation26] sm:$0xff]  }
 0x4d6   :  { %2246 = vmatprep.subr.bf16.mxu0 %v3089_v0 }
 0x4d9   :  { %2247 = vmatpush3.bf16.msra.mxu0 %v2478_v43  ;;  %v2502_v43 = vld [vmem:[#allocation26 + $0x8] sm:$0xff]  }
 0x4da   :  { %2248 = vmatprep.subr.bf16.mxu0 %v3089_v0 }
 0x4dd   :  { %2249 = vmatpush3.bf16.msra.mxu0 %v2479_v44  ;;  %v2503_v44 = vld [vmem:[#allocation26 + $0x10] sm:$0xff]  }
 0x4de   :  { %2250 = vmatprep.subr.bf16.mxu0 %v3089_v0 }
 0x4e1   :  { %2251 = vmatpush3.bf16.msra.mxu0 %v2480_v45  ;;  %v2504_v45 = vld [vmem:[#allocation26 + $0x18] sm:$0xff]  }
 0x4e2   :  { %2252 = vmatprep.subr.bf16.mxu0 %v3089_v0 }
 0x4e5   :  { %2253 = vmatpush3.bf16.msra.mxu0 %v2481_v46  ;;  %v2505_v46 = vld [vmem:[#allocation26 + $0x20] sm:$0xff]  }
 0x4e6   :  { %2254 = vmatprep.subr.bf16.mxu0 %v3089_v0 }
 0x4e9   :  { %2255 = vmatpush3.bf16.msra.mxu0 %v2482_v47  ;;  %v2506_v47 = vld [vmem:[#allocation26 + $0x28] sm:$0xff]  }
 0x4ea   :  { %2256 = vmatprep.subr.bf16.mxu0 %v3089_v0 }
 0x4ed   :  { %2257 = vmatpush3.bf16.msra.mxu0 %v2483_v48  ;;  %v2508_v48 = vld [vmem:[#allocation26 + $0x38] sm:$0xff]  }
 0x4ee   :  { %2258 = vmatprep.subr.bf16.mxu0 %v3089_v0 }
 0x4f1   :  { %2259 = vmatpush3.bf16.msra.mxu0 %v2484_v49  ;;  %v1962_v49 = vld [vmem:[#allocation19] ss:$0 sm:$0xff] }
 0x4f2   :  { %2284 = vmatprep.subr.bf16.mxu0 %v3089_v0 }
 0x5a7   :  { %v992_v5 = vpop.f32.mrb[8].mxu0 }
 0x5a8   :  { %v993_v6 = vadd.f32 %v1944_v4, %v992_v5  ;;  %v2222_v7 = vpop.f32.mrb[9].mxu0 }
 0x5a9   :  { %v995_v8 = vpop.f32.mrb[10].mxu0 }
 0x5aa   :  { %v998_v9 = vrot.slane %v993_v6, 4  ;;  %v1005_v10 = vmul.f32 %v993_v6, %v993_v6  ;;  %v2223_v11 = vpop.f32.mrb[11].mxu0 }
 0x5ac   :  { %v999_v12 = vadd.f32 %v998_v9, %v993_v6  ;;  %v1006_v13 = vrot.slane %v1005_v10, 4 }
 0x5ae   :  { %v1000_v14 = vrot.slane %v999_v12, 2  ;;  %v1007_v15 = vadd.f32 %v1006_v13, %v1005_v10 }
 0x5b0   :  { %v1001_v16 = vadd.f32 %v1000_v14, %v999_v12  ;;  %v1008_v17 = vrot.slane %v1007_v15, 2 }
 0x5b2   :  { %v1002_v18 = vrot.slane %v1001_v16, 1  ;;  %v1009_v19 = vadd.f32 %v1008_v17, %v1007_v15 }
 0x5b4   :  { %v1003_v20 = vadd.f32 %v1002_v18, %v1001_v16  ;;  %v1010_v21 = vrot.slane %v1009_v19, 1 }
 0x5b6   :  { %v1004_v22 = vmul.f32 0.125, %v1003_v20  ;;  %v1011_v23 = vadd.f32 %v1010_v21, %v1009_v19  ;;  %v2485_v21 = vld [vmem:[#allocation23] sm:$0xff]  }
 0x5b8   :  { %v1012_v24 = vmul.f32 0.125, %v1011_v23  ;;  %v1013_v25 = vmul.f32 %v1004_v22, %v1004_v22  ;;  %v1016_v29 = vsub.f32 %v993_v6, %v1004_v22  ;;  %v2486_v23 = vld [vmem:[#allocation23 + $0x8] sm:$0xff]  }
 0x5ba   :  { %v1014_v26 = vsub.f32 %v1012_v24, %v1013_v25  ;;  %v2487_v24 = vld [vmem:[#allocation23 + $0x10] sm:$0xff]   ;;  %v2488_v25 = vld [vmem:[#allocation23 + $0x18] sm:$0xff]  }
 0x5bc   :  { %v1015_v27 = vmax.f32 %v1014_v26, 0.0  ;;  %v2489_v26 = vld [vmem:[#allocation23 + $0x20] sm:$0xff]  }
 0x5be   :  { %v1017_v28 = vadd.f32 1e-05, %v1015_v27  ;;  %v2490_v27 = vld [vmem:[#allocation23 + $0x28] sm:$0xff]  }
 0x5c0   :  { %2523 = vrsqrt.f32 %v1017_v28  ;;  %v1971_v28 = vld [vmem:[#allocation22] ss:$0 sm:$0xff] }
 0x5ca   :  { %v2524_v30 = vpop.eup %2523 }
 0x5cb   :  { %v1019_v31 = vmul.f32 %v2524_v30, %v1016_v29  ;;  %v2491_v29 = vld [vmem:[#allocation23 + $0x30] sm:$0xff]  }
 0x5cd   :  { %v1020_v32 = vmax.f32 %v1019_v31, 0.0  ;;  %v2492_v31 = vld [vmem:[#allocation23 + $0x38] sm:$0xff]  }
 0x5cf   :  { %v1021_v34 = vpack.c.bf16 %v1020_v32, %v1020_v32 }
 0x5d1   :  { %2241 = vmatmul.mubr.bf16.vlgmr.msra.gmra.mrb[8].mxu1 %v1021_v34 }
 0x5d2   :  { %2265 = vmatpush3.bf16.msra.mxu1 %v2469_v33  ;;  %2280 = vmatprep.mubr.msk.bf16.mxu1 %vm3090_vm0, %v3089_v0  ;;  %v2493_v33 = vld [vmem:[#allocation29] sm:$0xff]  }
 0x5d3   :  { %2266 = vmatprep.subr.bf16.mxu1 %v3089_v0 }
 0x5d6   :  { %2267 = vmatpush3.bf16.msra.mxu1 %v2470_v35  ;;  %v2494_v35 = vld [vmem:[#allocation29 + $0x8] sm:$0xff]  }
 0x5d7   :  { %2268 = vmatprep.subr.bf16.mxu1 %v3089_v0 }
 0x5da   :  { %2269 = vmatpush3.bf16.msra.mxu1 %v2471_v36  ;;  %v2495_v36 = vld [vmem:[#allocation29 + $0x10] sm:$0xff]  }
 0x5db   :  { %2270 = vmatprep.subr.bf16.mxu1 %v3089_v0 }
 0x5de   :  { %2271 = vmatpush3.bf16.msra.mxu1 %v2472_v37  ;;  %v2496_v37 = vld [vmem:[#allocation29 + $0x18] sm:$0xff]  }
 0x5df   :  { %2272 = vmatprep.subr.bf16.mxu1 %v3089_v0 }
 0x5e2   :  { %2273 = vmatpush3.bf16.msra.mxu1 %v2473_v38  ;;  %v2497_v38 = vld [vmem:[#allocation29 + $0x20] sm:$0xff]  }
 0x5e3   :  { %2274 = vmatprep.subr.bf16.mxu1 %v3089_v0 }
 0x5e6   :  { %2275 = vmatpush3.bf16.msra.mxu1 %v2474_v39  ;;  %v2498_v39 = vld [vmem:[#allocation29 + $0x28] sm:$0xff]  }
 0x5e7   :  { %2276 = vmatprep.subr.bf16.mxu1 %v3089_v0 }
 0x5ea   :  { %2277 = vmatpush3.bf16.msra.mxu1 %v2475_v40  ;;  %v2499_v40 = vld [vmem:[#allocation29 + $0x30] sm:$0xff]  }
 0x5eb   :  { %2278 = vmatprep.subr.bf16.mxu1 %v3089_v0 }
 0x5ee   :  { %2279 = vmatpush3.bf16.msra.mxu1 %v2476_v41  ;;  %v2500_v41 = vld [vmem:[#allocation29 + $0x38] sm:$0xff]  }
 0x5ef   :  { %2304 = vmatprep.subr.bf16.mxu1 %v3089_v0 }
 0x5f1   :  { %2281 = vmatmul.mubr.bf16.vlgmr.msra.gmra.mrb[12].mxu1 %v3486_v58 }
 0x5f2   :  { %2320 = vmatprep.mubr.msk.bf16.mxu1 %vm3090_vm0, %v3089_v0  ;;  %2305 = vmatpush3.bf16.msra.mxu1 %v2501_v42 }
 0x5f3   :  { %2306 = vmatprep.subr.bf16.mxu1 %v3089_v0 }
 0x5f6   :  { %2307 = vmatpush3.bf16.msra.mxu1 %v2502_v43 }
 0x5f7   :  { %2308 = vmatprep.subr.bf16.mxu1 %v3089_v0 }
 0x5fa   :  { %2309 = vmatpush3.bf16.msra.mxu1 %v2503_v44 }
 0x5fb   :  { %2310 = vmatprep.subr.bf16.mxu1 %v3089_v0 }
 0x5fe   :  { %2311 = vmatpush3.bf16.msra.mxu1 %v2504_v45 }
 0x5ff   :  { %2312 = vmatprep.subr.bf16.mxu1 %v3089_v0 }
 0x602   :  { %2313 = vmatpush3.bf16.msra.mxu1 %v2505_v46 }
 0x603   :  { %2314 = vmatprep.subr.bf16.mxu1 %v3089_v0 }
 0x606   :  { %2315 = vmatpush3.bf16.msra.mxu1 %v2506_v47 }
 0x607   :  { %2316 = vmatprep.subr.bf16.mxu1 %v3089_v0 }
 0x6a4   :  { %v1127_v51 = vpop.f32.mrb[8].mxu1 }
 0x6a5   :  { %v1128_v52 = vadd.f32 %v1953_v50, %v1127_v51  ;;  %v2242_v53 = vpop.f32.mrb[9].mxu1 }
 0x6a6   :  { %v1130_v54 = vpop.f32.mrb[10].mxu1 }
 0x6a7   :  { %v1133_v55 = vrot.slane %v1128_v52, 4  ;;  %v1140_v56 = vmul.f32 %v1128_v52, %v1128_v52  ;;  %v2243_v57 = vpop.f32.mrb[11].mxu1 }
 0x6a9   :  { %v1134_v59 = vadd.f32 %v1133_v55, %v1128_v52  ;;  %v1141_v60 = vrot.slane %v1140_v56, 4  ;;  %v1980_v55 = vld [vmem:[#allocation25] ss:$0 sm:$0xff] }
 0x6ab   :  { %v1135_v61 = vrot.slane %v1134_v59, 2  ;;  %v1142_v62 = vadd.f32 %v1141_v60, %v1140_v56 }
 0x6ad   :  { %v1136_v63 = vadd.f32 %v1135_v61, %v1134_v59  ;;  %v1143_v1 = vrot.slane %v1142_v62, 2 }
 0x6af   :  { %v1137_v2 = vrot.slane %v1136_v63, 1  ;;  %v1144_v3 = vadd.f32 %v1143_v1, %v1142_v62 }
 0x6b1   :  { %v1138_v4 = vadd.f32 %v1137_v2, %v1136_v63  ;;  %v1145_v5 = vrot.slane %v1144_v3, 1  ;;  %v2509_v63 = vld [vmem:[#allocation32] sm:$0xff]   ;;  %v2510_v2 = vld [vmem:[#allocation32 + $0x8] sm:$0xff]  }
 0x6b3   :  { %v1139_v6 = vmul.f32 0.125, %v1138_v4  ;;  %v1146_v7 = vadd.f32 %v1145_v5, %v1144_v3  ;;  %v2511_v3 = vld [vmem:[#allocation32 + $0x10] sm:$0xff]   ;;  %v2512_v4 = vld [vmem:[#allocation32 + $0x18] sm:$0xff]   ;;  %v2513_v5 = vld [vmem:[#allocation32 + $0x20] sm:$0xff]  }
 0x6b5   :  { %v1147_v8 = vmul.f32 0.125, %v1146_v7  ;;  %v1148_v9 = vmul.f32 %v1139_v6, %v1139_v6  ;;  %v1151_v15 = vsub.f32 %v1128_v52, %v1139_v6  ;;  %v2514_v6 = vld [vmem:[#allocation32 + $0x28] sm:$0xff]   ;;  %v2515_v7 = vld [vmem:[#allocation32 + $0x30] sm:$0xff]  }
 0x6b7   :  { %v1149_v10 = vsub.f32 %v1147_v8, %v1148_v9  ;;  %v1998_v8 = vld [vmem:[#allocation31] ss:$0 sm:$0xff] }
 0x6b9   :  { %v1150_v11 = vmax.f32 %v1149_v10, 0.0  ;;  %v2516_v10 = vld [vmem:[#allocation32 + $0x38] sm:$0xff]  }
 0x6bb   :  { %v1152_v12 = vadd.f32 1e-05, %v1150_v11 }
 0x6bd   :  { %2525 = vrsqrt.f32 %v1152_v12 }
 0x6c4   :  { %v1374_v13 = vpop.f32.mrb[12].mxu1 }
 0x6c5   :  { %v2282_v14 = vpop.f32.mrb[13].mxu1  ;;  %v1375_v30 = vadd.f32 %v1971_v28, %v1374_v13 }
 0x6c6   :  { %v1377_v16 = vpop.f32.mrb[14].mxu1 }
 0x6c7   :  { %v2526_v17 = vpop.eup %2525  ;;  %v2283_v18 = vpop.f32.mrb[15].mxu1  ;;  %v1380_v32 = vmax.f32 %v1375_v30, 0.0 }
 0x6c8   :  { %v1154_v19 = vmul.f32 %v2526_v17, %v1151_v15 }
 0x6c9   :  { %v1381_v34 = vpack.c.bf16 %v1380_v32, %v1380_v32 }
 0x6ca   :  { %v1155_v20 = vmax.f32 %v1154_v19, 0.0 }
 0x6cc   :  { %v1156_v22 = vpack.c.bf16 %v1155_v20, %v1155_v20 }
 0x6ce   :  { %2261 = vmatmul.mubr.bf16.vlgmr.msra.gmra.mrb[12].mxu0 %v1156_v22 }
 0x6cf   :  { %2285 = vmatpush3.bf16.msra.mxu0 %v2485_v21  ;;  %2300 = vmatprep.mubr.msk.bf16.mxu0 %vm3090_vm0, %v3089_v0 }
 0x6d0   :  { %2286 = vmatprep.subr.bf16.mxu0 %v3089_v0 }
 0x6d3   :  { %2287 = vmatpush3.bf16.msra.mxu0 %v2486_v23 }
 0x6d4   :  { %2288 = vmatprep.subr.bf16.mxu0 %v3089_v0 }
 0x6d7   :  { %2289 = vmatpush3.bf16.msra.mxu0 %v2487_v24 }
 0x6d8   :  { %2290 = vmatprep.subr.bf16.mxu0 %v3089_v0 }
 0x6db   :  { %2291 = vmatpush3.bf16.msra.mxu0 %v2488_v25 }
 0x6dc   :  { %2292 = vmatprep.subr.bf16.mxu0 %v3089_v0 }
 0x6df   :  { %2293 = vmatpush3.bf16.msra.mxu0 %v2489_v26 }
 0x6e0   :  { %2294 = vmatprep.subr.bf16.mxu0 %v3089_v0 }
 0x6e3   :  { %2295 = vmatpush3.bf16.msra.mxu0 %v2490_v27 }
 0x6e4   :  { %2296 = vmatprep.subr.bf16.mxu0 %v3089_v0 }
 0x6e7   :  { %2297 = vmatpush3.bf16.msra.mxu0 %v2491_v29 }
 0x6e8   :  { %2298 = vmatprep.subr.bf16.mxu0 %v3089_v0 }
 0x6eb   :  { %2299 = vmatpush3.bf16.msra.mxu0 %v2492_v31 }
 0x6ec   :  { %2324 = vmatprep.subr.bf16.mxu0 %v3089_v0 }
 0x6ee   :  { %2301 = vmatmul.mubr.bf16.vlgmr.msra.gmra.mrb[16].mxu0 %v1381_v34 }
 0x6ef   :  { %2325 = vmatpush3.bf16.msra.mxu0 %v2493_v33  ;;  %2340 = vmatprep.mubr.msk.bf16.mxu0 %vm3090_vm0, %v3089_v0 }
 0x6f0   :  { %2326 = vmatprep.subr.bf16.mxu0 %v3089_v0 }
 0x6f3   :  { %2327 = vmatpush3.bf16.msra.mxu0 %v2494_v35 }
 0x6f4   :  { %2328 = vmatprep.subr.bf16.mxu0 %v3089_v0 }
 0x6f7   :  { %2329 = vmatpush3.bf16.msra.mxu0 %v2495_v36 }
 0x6f8   :  { %2330 = vmatprep.subr.bf16.mxu0 %v3089_v0 }
 0x6fb   :  { %2331 = vmatpush3.bf16.msra.mxu0 %v2496_v37 }
 0x6fc   :  { %2332 = vmatprep.subr.bf16.mxu0 %v3089_v0 }
 0x6ff   :  { %2333 = vmatpush3.bf16.msra.mxu0 %v2497_v38 }
 0x700   :  { %2334 = vmatprep.subr.bf16.mxu0 %v3089_v0 }
 0x703   :  { %2335 = vmatpush3.bf16.msra.mxu0 %v2498_v39 }
 0x704   :  { %2336 = vmatprep.subr.bf16.mxu0 %v3089_v0 }
 0x707   :  { %2337 = vmatpush3.bf16.msra.mxu0 %v2499_v40 }
 0x708   :  { %2338 = vmatprep.subr.bf16.mxu0 %v3089_v0 }
 0x70b   :  { %2339 = vmatpush3.bf16.msra.mxu0 %v2500_v41 }
 0x70e   :  { %2341 = vmatmul.mubr.bf16.vlgmr.msra.gmra.mrb[20].mxu0 %v3486_v58  ;;  %v2507_v58 = vld [vmem:[#allocation26 + $0x30] sm:$0xff]  }
 0x70f   :  { %2317 = vmatpush3.bf16.msra.mxu1 %v2507_v58 }
 0x710   :  { %2318 = vmatprep.subr.bf16.mxu1 %v3089_v0 }
 0x713   :  { %2319 = vmatpush3.bf16.msra.mxu1 %v2508_v48 }
 0x714   :  { %2344 = vmatprep.subr.bf16.mxu1 %v3089_v0 }
 0x7a1   :  { %v1262_v50 = vpop.f32.mrb[12].mxu0 }
 0x7a2   :  { %v1263_v51 = vadd.f32 %v1962_v49, %v1262_v50  ;;  %v2262_v52 = vpop.f32.mrb[13].mxu0 }
 0x7a3   :  { %v1265_v53 = vpop.f32.mrb[14].mxu0 }
 0x7a4   :  { %1268 = vst [vmem:[#allocation35] sm:$0xff] %v1263_v51  ;;  %v2263_v54 = vpop.f32.mrb[15].mxu0 }
 0x7c1   :  { %v1487_v56 = vpop.f32.mrb[16].mxu0 }
 0x7c2   :  { %v1488_v57 = vadd.f32 %v1980_v55, %v1487_v56  ;;  %v2302_v59 = vpop.f32.mrb[17].mxu0 }
 0x7c3   :  { %v1490_v60 = vpop.f32.mrb[18].mxu0 }
 0x7c4   :  { %v1493_v61 = vmax.f32 %v1488_v57, 0.0  ;;  %v2303_v62 = vpop.f32.mrb[19].mxu0 }
 0x7c6   :  { %v1494_v1 = vpack.c.bf16 %v1493_v61, %v1493_v61 }
 0x7c8   :  { %2321 = vmatmul.mubr.bf16.vlgmr.msra.gmra.mrb[16].mxu1 %v1494_v1 }
 0x7c9   :  { %2345 = vmatpush3.bf16.msra.mxu1 %v2509_v63  ;;  %2360 = vmatprep.mubr.msk.bf16.mxu1 %vm3090_vm0, %v3089_v0 }
 0x7ca   :  { %2346 = vmatprep.subr.bf16.mxu1 %v3089_v0 }
 0x7cd   :  { %2347 = vmatpush3.bf16.msra.mxu1 %v2510_v2 }
 0x7ce   :  { %2348 = vmatprep.subr.bf16.mxu1 %v3089_v0 }
 0x7d1   :  { %2349 = vmatpush3.bf16.msra.mxu1 %v2511_v3 }
 0x7d2   :  { %2350 = vmatprep.subr.bf16.mxu1 %v3089_v0 }
 0x7d5   :  { %2351 = vmatpush3.bf16.msra.mxu1 %v2512_v4 }
 0x7d6   :  { %2352 = vmatprep.subr.bf16.mxu1 %v3089_v0 }
 0x7d9   :  { %2353 = vmatpush3.bf16.msra.mxu1 %v2513_v5 }
 0x7da   :  { %2354 = vmatprep.subr.bf16.mxu1 %v3089_v0 }
 0x7dd   :  { %2355 = vmatpush3.bf16.msra.mxu1 %v2514_v6 }
 0x7de   :  { %2356 = vmatprep.subr.bf16.mxu1 %v3089_v0 }
 0x7e1   :  { %v1712_v9 = vpop.f32.mrb[20].mxu0  ;;  %2357 = vmatpush3.bf16.msra.mxu1 %v2515_v7 }
 0x7e2   :  { %v1713_v11 = vadd.f32 %v1998_v8, %v1712_v9  ;;  %v2342_v12 = vpop.f32.mrb[21].mxu0  ;;  %2358 = vmatprep.subr.bf16.mxu1 %v3089_v0 }
 0x7e3   :  { %v1715_v13 = vpop.f32.mrb[22].mxu0 }
 0x7e4   :  { %v1718_v14 = vmax.f32 %v1713_v11, 0.0  ;;  %v2343_v15 = vpop.f32.mrb[23].mxu0 }
 0x7e5   :  { %2359 = vmatpush3.bf16.msra.mxu1 %v2516_v10 }
 0x7e6   :  { %v1719_v16 = vpack.c.bf16 %v1718_v14, %v1718_v14 }
 0x7e8   :  { %2361 = vmatmul.mubr.bf16.vlgmr.msra.gmra.mrb[20].mxu1 %v1719_v16 }
 0x7e9   :  { %3000 = shalt.err (!%p2997_p4)
}
 0x7ea   :  { %s3001_s3 = scalar_lea.hbm %s3245_s5, 128 }
 0x7eb   :  { %p3002_p5 = scmp.ne.s32.totalorder %s3245_s5, %s3001_s3  ;;  %p3005_p6 = scmp.lt.u32.totalorder %s3001_s3, %s3245_s5 }
 0x7ed   :  { %p3007_p7 = pnand %p3005_p6, %p3002_p5 }
 0x7ef   :  { %3010 = shalt.err (!%p3007_p7)
}
 0x7f0   :  { %1847 = dma.vmem_to_hbm [thread:$0]  %s1845_s8, 128, %s3245_s5, [#allocation4]   ;;  %v1989_v0 = vld [vmem:[#allocation28] ss:$0 sm:$0xff]  ;;  %v2007_v22 = vld [vmem:[#allocation34] ss:$0 sm:$0xff] }
 0x89b   :  { %v1600_v17 = vpop.f32.mrb[16].mxu1 }
 0x89c   :  { %v1601_v18 = vadd.f32 %v1989_v0, %v1600_v17  ;;  %v2322_v19 = vpop.f32.mrb[17].mxu1 }
 0x89d   :  { %v1603_v20 = vpop.f32.mrb[18].mxu1 }
 0x89e   :  { %1606 = vst [vmem:[%s3250_s20] sm:$0xff] %v1601_v18  ;;  %v2323_v21 = vpop.f32.mrb[19].mxu1 }
 0x8bb   :  { %v1825_v23 = vpop.f32.mrb[20].mxu1 }
 0x8bc   :  { %v1826_v24 = vadd.f32 %v2007_v22, %v1825_v23  ;;  %v2362_v25 = vpop.f32.mrb[21].mxu1 }
 0x8bd   :  { %v1828_v26 = vpop.f32.mrb[22].mxu1 }
 0x8be   :  { %1831 = vst [vmem:[%s3255_s29] sm:$0xff] %v1826_v24  ;;  %v2363_v27 = vpop.f32.mrb[23].mxu1 }
 0x8bf   :  { %3033 = dma.done.wait [#allocation4], 128  }
 0x8c0   :  { %3034 = vsyncadd [#allocation4], 4294967168 }
 0x8c1   :  { %1865 = vsyncpa [#allocation3], 1 }
 0x8c2   :  { %1866 = vsyncpa [#allocation6], 1 }
 0x8c3   :  { %1867 = vsyncpa [#allocation9], 1 }
 0x8c4   :  { %1868 = vsyncpa [#allocation12], 1 }
 0x8c5   :  { %1869 = vsyncpa [#allocation15], 1 }
 0x8c6   :  { %1870 = vsyncpa [#allocation18], 1 }
 0x8c7   :  { %1871 = vsyncpa [#allocation21], 1 }
 0x8c8   :  { %1872 = vsyncpa [#allocation24], 1 }
 0x8c9   :  { %1873 = vsyncpa [#allocation27], 1 }
 0x8ca   :  { %1874 = vsyncpa [#allocation30], 1 }
 0x8cb   :  { %1875 = vsyncpa [#allocation33], 1 }
 0x8cc   :  { %1876 = vsyncpa [#allocation4], 1 }

</bundles_post_ra>
